<compile_context>
chip_gen: v5e
topology: v5e:2x2
jax: 0.10.0
libtpu: 0.0.40
codegen_flags: <defaults>
</compile_context>

<pallas_src>
import functools

import jax
import jax.numpy as jnp
from jax import lax
from jax.experimental import pallas as pl
from jax.experimental.pallas import tpu as pltpu


# --------------------------- fused decoder kernel ----------------------------
def _decoder_kernel(tok_ref, emb_ref, h0_ref, wih_ref, whh_ref, bih_ref,
                    bhh_ref, wlin_ref, blin_ref, out_ref, hid_ref, y_ref):
    L, N, H = h0_ref.shape          # num_layers, batch (=A), hidden
    V = emb_ref.shape[0]            # vocab / output size
    SN = tok_ref.shape[0]           # seq_len * batch
    S = SN // N                     # seq_len (=B)

    # ---- embedding lookup as a one-hot MXU matmul, then ReLU (F.relu) ------
    tok = tok_ref[...]                                             # (SN, 1) i32
    onehot = (tok == lax.broadcasted_iota(jnp.int32, (SN, V), 1)
              ).astype(jnp.float32)                                # (SN, V)
    x = jnp.dot(onehot, emb_ref[...],
                preferred_element_type=jnp.float32)                # (SN, H)
    x = jnp.maximum(x, 0.0)

    # ---------------------------- GRU layers --------------------------------
    # TODO(synk): nn.GRU inter-layer dropout is a no-op in eval mode; not modeled.
    for l in range(L):
        # Input projection for ALL timesteps at once (one MXU matmul/layer).
        gx_all = jnp.dot(x, wih_ref[l],
                         preferred_element_type=jnp.float32) + bih_ref[l]
        whh = whh_ref[l]                                           # (H, 3H)
        bhh = bhh_ref[l]                                           # (1, 3H)
        h = h0_ref[l]                                              # (N, H)

        # Fully unrolled recurrence over the sequence (static trip count).
        for s in range(S):
            gx = gx_all[s * N:(s + 1) * N, :]                      # (N, 3H)
            gh = jnp.dot(h, whh,
                         preferred_element_type=jnp.float32) + bhh # (N, 3H)
            r = jax.nn.sigmoid(gx[:, 0:H] + gh[:, 0:H])
            z = jax.nn.sigmoid(gx[:, H:2 * H] + gh[:, H:2 * H])
            n = jnp.tanh(gx[:, 2 * H:3 * H] + r * gh[:, 2 * H:3 * H])
            h = (1.0 - z) * n + z * h
            y_ref[s * N:(s + 1) * N, :] = h                        # stash y_t

        hid_ref[l] = h                                             # final h
        x = y_ref[...]                                             # next layer

    # --------------------- linear + softmax(dim=0) --------------------------
    logits = jnp.dot(x, wlin_ref[...],
                     preferred_element_type=jnp.float32) + blin_ref[...]
    # PyTorch: output.view(A, B, -1) is a flat reshape of the (S*N, V) buffer.
    logits = logits.reshape(N, S, V)                               # (A, B, V)
    # nn.Softmax() with dim=None on a 3-D input -> softmax along dim 0.
    m = jnp.max(logits, axis=0, keepdims=True)
    e = jnp.exp(logits - m)
    out_ref[...] = e / jnp.sum(e, axis=0, keepdims=True)


def decoder_call(tok, emb, h0, wih_t, whh_t, bih, bhh, w_lin_t, b_lin):
    L, N, H = h0.shape
    V = emb.shape[0]
    SN = tok.shape[0]
    S = SN // N

    return pl.pallas_call(
        _decoder_kernel,
        out_shape=(jax.ShapeDtypeStruct((N, S, V), jnp.float32),   # (A, B, V)
                   jax.ShapeDtypeStruct((L, N, H), jnp.float32)),  # (L, A, H)
        grid_spec=pltpu.PrefetchScalarGridSpec(
            num_scalar_prefetch=0,
            grid=(1,),                               # single fused invocation
            in_specs=[
                pl.BlockSpec((SN, 1), lambda i: (0, 0)),           # token ids
                pl.BlockSpec((V, H), lambda i: (0, 0)),            # embedding
                pl.BlockSpec((L, N, H), lambda i: (0, 0, 0)),      # h0
                pl.BlockSpec((L, H, 3 * H), lambda i: (0, 0, 0)),  # W_ih^T
                pl.BlockSpec((L, H, 3 * H), lambda i: (0, 0, 0)),  # W_hh^T
                pl.BlockSpec((L, 1, 3 * H), lambda i: (0, 0, 0)),  # b_ih
                pl.BlockSpec((L, 1, 3 * H), lambda i: (0, 0, 0)),  # b_hh
                pl.BlockSpec((H, V), lambda i: (0, 0)),            # W_lin^T
                pl.BlockSpec((1, V), lambda i: (0, 0)),            # b_lin
            ],
            out_specs=[
                pl.BlockSpec((N, S, V), lambda i: (0, 0, 0)),      # softmax out
                pl.BlockSpec((L, N, H), lambda i: (0, 0, 0)),      # final hidden
            ],
            scratch_shapes=[
                pltpu.VMEM((SN, H), jnp.float32),    # inter-layer activations
            ],
        ),
        compiler_params=pltpu.CompilerParams(
            dimension_semantics=("arbitrary",)),
    )(tok, emb, h0, wih_t, whh_t, bih, bhh, w_lin_t, b_lin)


# ------------------------------- forward pass --------------------------------
def decoder_forward(params, inp, hidden):
    A, B = inp.shape                     # original PyTorch input (d0, d1)
    H = params["embedding"].shape[1]
    L = hidden.shape[1]
    S, N = B, A                          # GRU: seq_len = B, batch = A

    # input.view(B, A, 1) / hidden.view(L, A, H): flat reshapes (no transpose).
    tok = inp.reshape(S * N, 1).astype(jnp.int32)
    h0 = hidden.reshape(L, N, H)

    # Pre-transpose / stack per-layer parameters once (tiny, traced glue).
    wih_t = jnp.stack([params[f"w_ih_{l}"].T for l in range(L)])       # (L,H,3H)
    whh_t = jnp.stack([params[f"w_hh_{l}"].T for l in range(L)])       # (L,H,3H)
    bih = jnp.stack([params[f"b_ih_{l}"].reshape(1, 3 * H) for l in range(L)])
    bhh = jnp.stack([params[f"b_hh_{l}"].reshape(1, 3 * H) for l in range(L)])
    w_lin_t = params["w_lin"].T                                        # (H, V)
    b_lin = params["b_lin"].reshape(1, -1)                             # (1, V)

    out, hT = decoder_call(tok, params["embedding"], h0,
                           wih_t, whh_t, bih, bhh, w_lin_t, b_lin)

    hidden_out = hT.reshape(A, L, H)     # hidden.view(A, L, H): flat reshape
    return out, hidden_out               # out: (A, B, V)


# ------------------------------- parameters ----------------------------------
def init_params(key, hidden_size, output_size, num_layers):
    H, V = hidden_size, output_size
    k = 1.0 / float(H) ** 0.5
    keys = jax.random.split(key, 3 + num_layers)
    params = {
        "embedding": jax.random.normal(keys[0], (V, H), jnp.float32),
        "w_lin": jax.random.uniform(keys[1], (V, H), jnp.float32, -k, k),
        "b_lin": jax.random.uniform(keys[2], (V,), jnp.float32, -k, k),
    }
    for l in range(num_layers):
        kk = jax.random.split(keys[3 + l], 4)
        params[f"w_ih_{l}"] = jax.random.uniform(kk[0], (3 * H, H), jnp.float32, -k, k)
        params[f"w_hh_{l}"] = jax.random.uniform(kk[1], (3 * H, H), jnp.float32, -k, k)
        params[f"b_ih_{l}"] = jax.random.uniform(kk[2], (3 * H,), jnp.float32, -k, k)
        params[f"b_hh_{l}"] = jax.random.uniform(kk[3], (3 * H,), jnp.float32, -k, k)
    return params


if __name__ == "__main__":
    hidden_size, output_size, num_layers = 32, 64, 2
    A, B = 2, 8            # original input shape (d0, d1); GRU sees seq=B, batch=A

    key = jax.random.PRNGKey(0)
    kp, ki, kh = jax.random.split(key, 3)
    params = init_params(kp, hidden_size, output_size, num_layers)

    inp = jax.random.randint(ki, (A, B), 0, output_size, dtype=jnp.int32)
    hidden = jax.random.normal(kh, (A, num_layers, hidden_size), jnp.float32)

    fwd = jax.jit(functools.partial(decoder_forward, params))
    out, hid = fwd(inp, hidden)
    jax.block_until_ready((out, hid))

    assert out.shape == (A, B, output_size)
    assert hid.shape == (A, num_layers, hidden_size)
    print("KERNEL_OK")
</pallas_src>

<mosaic_0001>
module attributes {stable_mosaic.version = 11 : i64} {
  func.func @_decoder_kernel(%arg0: i32, %arg1: memref<16x1xi32, #tpu.memory_space<vmem>>, %arg2: memref<64x32xf32, #tpu.memory_space<vmem>>, %arg3: memref<2x2x32xf32, #tpu.memory_space<vmem>>, %arg4: memref<2x32x96xf32, #tpu.memory_space<vmem>>, %arg5: memref<2x32x96xf32, #tpu.memory_space<vmem>>, %arg6: memref<2x1x96xf32, #tpu.memory_space<vmem>>, %arg7: memref<2x1x96xf32, #tpu.memory_space<vmem>>, %arg8: memref<32x64xf32, #tpu.memory_space<vmem>>, %arg9: memref<1x64xf32, #tpu.memory_space<vmem>>, %arg10: memref<2x8x64xf32, #tpu.memory_space<vmem>>, %arg11: memref<2x2x32xf32, #tpu.memory_space<vmem>>, %arg12: memref<16x32xf32, #tpu.memory_space<vmem>>) attributes {dimension_semantics = [#tpu.dimension_semantics<arbitrary>], iteration_bounds = array<i64: 1>, scalar_prefetch = 0 : i64, scratch_operands = 1 : i64, tpu.core_type = #tpu.core_type<tc>, window_params = [{pipeline_mode = #tpu.pipeline_mode<synchronous>, transform_indices = @transform_0, window_bounds = array<i64: 16, 1>}, {pipeline_mode = #tpu.pipeline_mode<synchronous>, transform_indices = @transform_1, window_bounds = array<i64: 64, 32>}, {pipeline_mode = #tpu.pipeline_mode<synchronous>, transform_indices = @transform_2, window_bounds = array<i64: 2, 2, 32>}, {pipeline_mode = #tpu.pipeline_mode<synchronous>, transform_indices = @transform_3, window_bounds = array<i64: 2, 32, 96>}, {pipeline_mode = #tpu.pipeline_mode<synchronous>, transform_indices = @transform_4, window_bounds = array<i64: 2, 32, 96>}, {pipeline_mode = #tpu.pipeline_mode<synchronous>, transform_indices = @transform_5, window_bounds = array<i64: 2, 1, 96>}, {pipeline_mode = #tpu.pipeline_mode<synchronous>, transform_indices = @transform_6, window_bounds = array<i64: 2, 1, 96>}, {pipeline_mode = #tpu.pipeline_mode<synchronous>, transform_indices = @transform_7, window_bounds = array<i64: 32, 64>}, {pipeline_mode = #tpu.pipeline_mode<synchronous>, transform_indices = @transform_8, window_bounds = array<i64: 1, 64>}, {pipeline_mode = #tpu.pipeline_mode<synchronous>, transform_indices = @transform_9, window_bounds = array<i64: 2, 8, 64>}, {pipeline_mode = #tpu.pipeline_mode<synchronous>, transform_indices = @transform_10, window_bounds = array<i64: 2, 2, 32>}]} {
    %c0 = arith.constant 0 : index
    %c0_0 = arith.constant 0 : index
    %0 = vector.load %arg1[%c0, %c0_0] : memref<16x1xi32, #tpu.memory_space<vmem>>, vector<16x1xi32>
    %1 = tpu.iota {dimensions = array<i32: 1>} : vector<16x64xi32>
    %2 = vector.broadcast %0 : vector<16x1xi32> to vector<16x64xi32>
    %3 = arith.cmpi eq, %2, %1 : vector<16x64xi32>
    %4 = arith.extui %3 : vector<16x64xi1> to vector<16x64xi32>
    %5 = arith.sitofp %4 : vector<16x64xi32> to vector<16x64xf32>
    %c0_1 = arith.constant 0 : index
    %c0_2 = arith.constant 0 : index
    %6 = vector.load %arg2[%c0_1, %c0_2] : memref<64x32xf32, #tpu.memory_space<vmem>>, vector<64x32xf32>
    %cst = arith.constant dense<0.000000e+00> : vector<16x32xf32>
    %7 = tpu.matmul %5, %6, %cst {dimension_numbers = #tpu.dot_dimension_numbers<[1], [0], [0], [1], [0, 0, 1, 1], [], []>} : vector<16x64xf32>, vector<64x32xf32>, vector<16x32xf32> -> vector<16x32xf32>
    %cst_3 = arith.constant 0.000000e+00 : f32
    %8 = vector.broadcast %cst_3 : f32 to vector<16x32xf32>
    %9 = arith.maximumf %7, %8 : vector<16x32xf32>
    %c0_4 = arith.constant 0 : index
    %c0_5 = arith.constant 0 : index
    %c0_6 = arith.constant 0 : index
    %10 = vector.load %arg4[%c0_4, %c0_5, %c0_6] : memref<2x32x96xf32, #tpu.memory_space<vmem>>, vector<1x32x96xf32>
    %11 = vector.shape_cast %10 : vector<1x32x96xf32> to vector<32x96xf32>
    %cst_7 = arith.constant dense<0.000000e+00> : vector<16x96xf32>
    %12 = tpu.matmul %9, %11, %cst_7 {dimension_numbers = #tpu.dot_dimension_numbers<[1], [0], [0], [1], [0, 0, 1, 1], [], []>} : vector<16x32xf32>, vector<32x96xf32>, vector<16x96xf32> -> vector<16x96xf32>
    %c0_8 = arith.constant 0 : index
    %c0_9 = arith.constant 0 : index
    %c0_10 = arith.constant 0 : index
    %13 = vector.load %arg6[%c0_8, %c0_9, %c0_10] : memref<2x1x96xf32, #tpu.memory_space<vmem>>, vector<1x1x96xf32>
    %14 = vector.shape_cast %13 : vector<1x1x96xf32> to vector<1x96xf32>
    %15 = vector.broadcast %14 : vector<1x96xf32> to vector<16x96xf32>
    %16 = arith.addf %12, %15 : vector<16x96xf32>
    %c0_11 = arith.constant 0 : index
    %c0_12 = arith.constant 0 : index
    %c0_13 = arith.constant 0 : index
    %17 = vector.load %arg5[%c0_11, %c0_12, %c0_13] : memref<2x32x96xf32, #tpu.memory_space<vmem>>, vector<1x32x96xf32>
    %18 = vector.shape_cast %17 : vector<1x32x96xf32> to vector<32x96xf32>
    %c0_14 = arith.constant 0 : index
    %c0_15 = arith.constant 0 : index
    %c0_16 = arith.constant 0 : index
    %19 = vector.load %arg7[%c0_14, %c0_15, %c0_16] : memref<2x1x96xf32, #tpu.memory_space<vmem>>, vector<1x1x96xf32>
    %20 = vector.shape_cast %19 : vector<1x1x96xf32> to vector<1x96xf32>
    %c0_17 = arith.constant 0 : index
    %c0_18 = arith.constant 0 : index
    %c0_19 = arith.constant 0 : index
    %21 = vector.load %arg3[%c0_17, %c0_18, %c0_19] : memref<2x2x32xf32, #tpu.memory_space<vmem>>, vector<1x2x32xf32>
    %22 = vector.shape_cast %21 : vector<1x2x32xf32> to vector<2x32xf32>
    %23 = vector.extract_strided_slice %16 {offsets = [0, 0], sizes = [2, 96], strides = [1, 1]} : vector<16x96xf32> to vector<2x96xf32>
    %cst_20 = arith.constant dense<0.000000e+00> : vector<2x96xf32>
    %24 = tpu.matmul %22, %18, %cst_20 {dimension_numbers = #tpu.dot_dimension_numbers<[1], [0], [0], [1], [0, 0, 1, 1], [], []>} : vector<2x32xf32>, vector<32x96xf32>, vector<2x96xf32> -> vector<2x96xf32>
    %25 = vector.broadcast %20 : vector<1x96xf32> to vector<2x96xf32>
    %26 = arith.addf %24, %25 : vector<2x96xf32>
    %27 = vector.extract_strided_slice %23 {offsets = [0, 0], sizes = [2, 32], strides = [1, 1]} : vector<2x96xf32> to vector<2x32xf32>
    %28 = vector.extract_strided_slice %26 {offsets = [0, 0], sizes = [2, 32], strides = [1, 1]} : vector<2x96xf32> to vector<2x32xf32>
    %29 = arith.addf %27, %28 : vector<2x32xf32>
    %30 = arith.negf %29 : vector<2x32xf32>
    %31 = math.exp %30 : vector<2x32xf32>
    %cst_21 = arith.constant 1.000000e+00 : f32
    %32 = vector.broadcast %cst_21 : f32 to vector<2x32xf32>
    %33 = arith.addf %32, %31 : vector<2x32xf32>
    %34 = arith.divf %32, %33 : vector<2x32xf32>
    %35 = vector.extract_strided_slice %23 {offsets = [0, 32], sizes = [2, 32], strides = [1, 1]} : vector<2x96xf32> to vector<2x32xf32>
    %36 = vector.extract_strided_slice %26 {offsets = [0, 32], sizes = [2, 32], strides = [1, 1]} : vector<2x96xf32> to vector<2x32xf32>
    %37 = arith.addf %35, %36 : vector<2x32xf32>
    %38 = arith.negf %37 : vector<2x32xf32>
    %39 = math.exp %38 : vector<2x32xf32>
    %cst_22 = arith.constant 1.000000e+00 : f32
    %40 = vector.broadcast %cst_22 : f32 to vector<2x32xf32>
    %41 = arith.addf %40, %39 : vector<2x32xf32>
    %42 = arith.divf %40, %41 : vector<2x32xf32>
    %43 = vector.extract_strided_slice %23 {offsets = [0, 64], sizes = [2, 32], strides = [1, 1]} : vector<2x96xf32> to vector<2x32xf32>
    %44 = vector.extract_strided_slice %26 {offsets = [0, 64], sizes = [2, 32], strides = [1, 1]} : vector<2x96xf32> to vector<2x32xf32>
    %45 = arith.mulf %34, %44 : vector<2x32xf32>
    %46 = arith.addf %43, %45 : vector<2x32xf32>
    %47 = math.tanh %46 : vector<2x32xf32>
    %cst_23 = arith.constant 1.000000e+00 : f32
    %48 = vector.broadcast %cst_23 : f32 to vector<2x32xf32>
    %49 = arith.subf %48, %42 : vector<2x32xf32>
    %50 = arith.mulf %49, %47 : vector<2x32xf32>
    %51 = arith.mulf %42, %22 : vector<2x32xf32>
    %52 = arith.addf %50, %51 : vector<2x32xf32>
    %c0_24 = arith.constant 0 : index
    %c0_25 = arith.constant 0 : index
    %53 = vector.load %arg12[%c0_24, %c0_25] : memref<16x32xf32, #tpu.memory_space<vmem>>, vector<2x32xf32>
    tpu.vector_store %arg12[%c0_24, %c0_25], %52 {strides = array<i32>} : memref<16x32xf32, #tpu.memory_space<vmem>>, vector<2x32xf32>,
    %54 = vector.extract_strided_slice %16 {offsets = [2, 0], sizes = [2, 96], strides = [1, 1]} : vector<16x96xf32> to vector<2x96xf32>
    %cst_26 = arith.constant dense<0.000000e+00> : vector<2x96xf32>
    %55 = tpu.matmul %52, %18, %cst_26 {dimension_numbers = #tpu.dot_dimension_numbers<[1], [0], [0], [1], [0, 0, 1, 1], [], []>} : vector<2x32xf32>, vector<32x96xf32>, vector<2x96xf32> -> vector<2x96xf32>
    %56 = vector.broadcast %20 : vector<1x96xf32> to vector<2x96xf32>
    %57 = arith.addf %55, %56 : vector<2x96xf32>
    %58 = vector.extract_strided_slice %54 {offsets = [0, 0], sizes = [2, 32], strides = [1, 1]} : vector<2x96xf32> to vector<2x32xf32>
    %59 = vector.extract_strided_slice %57 {offsets = [0, 0], sizes = [2, 32], strides = [1, 1]} : vector<2x96xf32> to vector<2x32xf32>
    %60 = arith.addf %58, %59 : vector<2x32xf32>
    %61 = arith.negf %60 : vector<2x32xf32>
    %62 = math.exp %61 : vector<2x32xf32>
    %cst_27 = arith.constant 1.000000e+00 : f32
    %63 = vector.broadcast %cst_27 : f32 to vector<2x32xf32>
    %64 = arith.addf %63, %62 : vector<2x32xf32>
    %65 = arith.divf %63, %64 : vector<2x32xf32>
    %66 = vector.extract_strided_slice %54 {offsets = [0, 32], sizes = [2, 32], strides = [1, 1]} : vector<2x96xf32> to vector<2x32xf32>
    %67 = vector.extract_strided_slice %57 {offsets = [0, 32], sizes = [2, 32], strides = [1, 1]} : vector<2x96xf32> to vector<2x32xf32>
    %68 = arith.addf %66, %67 : vector<2x32xf32>
    %69 = arith.negf %68 : vector<2x32xf32>
    %70 = math.exp %69 : vector<2x32xf32>
    %cst_28 = arith.constant 1.000000e+00 : f32
    %71 = vector.broadcast %cst_28 : f32 to vector<2x32xf32>
    %72 = arith.addf %71, %70 : vector<2x32xf32>
    %73 = arith.divf %71, %72 : vector<2x32xf32>
    %74 = vector.extract_strided_slice %54 {offsets = [0, 64], sizes = [2, 32], strides = [1, 1]} : vector<2x96xf32> to vector<2x32xf32>
    %75 = vector.extract_strided_slice %57 {offsets = [0, 64], sizes = [2, 32], strides = [1, 1]} : vector<2x96xf32> to vector<2x32xf32>
    %76 = arith.mulf %65, %75 : vector<2x32xf32>
    %77 = arith.addf %74, %76 : vector<2x32xf32>
    %78 = math.tanh %77 : vector<2x32xf32>
    %cst_29 = arith.constant 1.000000e+00 : f32
    %79 = vector.broadcast %cst_29 : f32 to vector<2x32xf32>
    %80 = arith.subf %79, %73 : vector<2x32xf32>
    %81 = arith.mulf %80, %78 : vector<2x32xf32>
    %82 = arith.mulf %73, %52 : vector<2x32xf32>
    %83 = arith.addf %81, %82 : vector<2x32xf32>
    %c2 = arith.constant 2 : index
    %c0_30 = arith.constant 0 : index
    %84 = vector.load %arg12[%c2, %c0_30] : memref<16x32xf32, #tpu.memory_space<vmem>>, vector<2x32xf32>
    tpu.vector_store %arg12[%c2, %c0_30], %83 {strides = array<i32>} : memref<16x32xf32, #tpu.memory_space<vmem>>, vector<2x32xf32>,
    %85 = vector.extract_strided_slice %16 {offsets = [4, 0], sizes = [2, 96], strides = [1, 1]} : vector<16x96xf32> to vector<2x96xf32>
    %cst_31 = arith.constant dense<0.000000e+00> : vector<2x96xf32>
    %86 = tpu.matmul %83, %18, %cst_31 {dimension_numbers = #tpu.dot_dimension_numbers<[1], [0], [0], [1], [0, 0, 1, 1], [], []>} : vector<2x32xf32>, vector<32x96xf32>, vector<2x96xf32> -> vector<2x96xf32>
    %87 = vector.broadcast %20 : vector<1x96xf32> to vector<2x96xf32>
    %88 = arith.addf %86, %87 : vector<2x96xf32>
    %89 = vector.extract_strided_slice %85 {offsets = [0, 0], sizes = [2, 32], strides = [1, 1]} : vector<2x96xf32> to vector<2x32xf32>
    %90 = vector.extract_strided_slice %88 {offsets = [0, 0], sizes = [2, 32], strides = [1, 1]} : vector<2x96xf32> to vector<2x32xf32>
    %91 = arith.addf %89, %90 : vector<2x32xf32>
    %92 = arith.negf %91 : vector<2x32xf32>
    %93 = math.exp %92 : vector<2x32xf32>
    %cst_32 = arith.constant 1.000000e+00 : f32
    %94 = vector.broadcast %cst_32 : f32 to vector<2x32xf32>
    %95 = arith.addf %94, %93 : vector<2x32xf32>
    %96 = arith.divf %94, %95 : vector<2x32xf32>
    %97 = vector.extract_strided_slice %85 {offsets = [0, 32], sizes = [2, 32], strides = [1, 1]} : vector<2x96xf32> to vector<2x32xf32>
    %98 = vector.extract_strided_slice %88 {offsets = [0, 32], sizes = [2, 32], strides = [1, 1]} : vector<2x96xf32> to vector<2x32xf32>
    %99 = arith.addf %97, %98 : vector<2x32xf32>
    %100 = arith.negf %99 : vector<2x32xf32>
    %101 = math.exp %100 : vector<2x32xf32>
    %cst_33 = arith.constant 1.000000e+00 : f32
    %102 = vector.broadcast %cst_33 : f32 to vector<2x32xf32>
    %103 = arith.addf %102, %101 : vector<2x32xf32>
    %104 = arith.divf %102, %103 : vector<2x32xf32>
    %105 = vector.extract_strided_slice %85 {offsets = [0, 64], sizes = [2, 32], strides = [1, 1]} : vector<2x96xf32> to vector<2x32xf32>
    %106 = vector.extract_strided_slice %88 {offsets = [0, 64], sizes = [2, 32], strides = [1, 1]} : vector<2x96xf32> to vector<2x32xf32>
    %107 = arith.mulf %96, %106 : vector<2x32xf32>
    %108 = arith.addf %105, %107 : vector<2x32xf32>
    %109 = math.tanh %108 : vector<2x32xf32>
    %cst_34 = arith.constant 1.000000e+00 : f32
    %110 = vector.broadcast %cst_34 : f32 to vector<2x32xf32>
    %111 = arith.subf %110, %104 : vector<2x32xf32>
    %112 = arith.mulf %111, %109 : vector<2x32xf32>
    %113 = arith.mulf %104, %83 : vector<2x32xf32>
    %114 = arith.addf %112, %113 : vector<2x32xf32>
    %c4 = arith.constant 4 : index
    %c0_35 = arith.constant 0 : index
    %115 = vector.load %arg12[%c4, %c0_35] : memref<16x32xf32, #tpu.memory_space<vmem>>, vector<2x32xf32>
    tpu.vector_store %arg12[%c4, %c0_35], %114 {strides = array<i32>} : memref<16x32xf32, #tpu.memory_space<vmem>>, vector<2x32xf32>,
    %116 = vector.extract_strided_slice %16 {offsets = [6, 0], sizes = [2, 96], strides = [1, 1]} : vector<16x96xf32> to vector<2x96xf32>
    %cst_36 = arith.constant dense<0.000000e+00> : vector<2x96xf32>
    %117 = tpu.matmul %114, %18, %cst_36 {dimension_numbers = #tpu.dot_dimension_numbers<[1], [0], [0], [1], [0, 0, 1, 1], [], []>} : vector<2x32xf32>, vector<32x96xf32>, vector<2x96xf32> -> vector<2x96xf32>
    %118 = vector.broadcast %20 : vector<1x96xf32> to vector<2x96xf32>
    %119 = arith.addf %117, %118 : vector<2x96xf32>
    %120 = vector.extract_strided_slice %116 {offsets = [0, 0], sizes = [2, 32], strides = [1, 1]} : vector<2x96xf32> to vector<2x32xf32>
    %121 = vector.extract_strided_slice %119 {offsets = [0, 0], sizes = [2, 32], strides = [1, 1]} : vector<2x96xf32> to vector<2x32xf32>
    %122 = arith.addf %120, %121 : vector<2x32xf32>
    %123 = arith.negf %122 : vector<2x32xf32>
    %124 = math.exp %123 : vector<2x32xf32>
    %cst_37 = arith.constant 1.000000e+00 : f32
    %125 = vector.broadcast %cst_37 : f32 to vector<2x32xf32>
    %126 = arith.addf %125, %124 : vector<2x32xf32>
    %127 = arith.divf %125, %126 : vector<2x32xf32>
    %128 = vector.extract_strided_slice %116 {offsets = [0, 32], sizes = [2, 32], strides = [1, 1]} : vector<2x96xf32> to vector<2x32xf32>
    %129 = vector.extract_strided_slice %119 {offsets = [0, 32], sizes = [2, 32], strides = [1, 1]} : vector<2x96xf32> to vector<2x32xf32>
    %130 = arith.addf %128, %129 : vector<2x32xf32>
    %131 = arith.negf %130 : vector<2x32xf32>
    %132 = math.exp %131 : vector<2x32xf32>
    %cst_38 = arith.constant 1.000000e+00 : f32
    %133 = vector.broadcast %cst_38 : f32 to vector<2x32xf32>
    %134 = arith.addf %133, %132 : vector<2x32xf32>
    %135 = arith.divf %133, %134 : vector<2x32xf32>
    %136 = vector.extract_strided_slice %116 {offsets = [0, 64], sizes = [2, 32], strides = [1, 1]} : vector<2x96xf32> to vector<2x32xf32>
    %137 = vector.extract_strided_slice %119 {offsets = [0, 64], sizes = [2, 32], strides = [1, 1]} : vector<2x96xf32> to vector<2x32xf32>
    %138 = arith.mulf %127, %137 : vector<2x32xf32>
    %139 = arith.addf %136, %138 : vector<2x32xf32>
    %140 = math.tanh %139 : vector<2x32xf32>
    %cst_39 = arith.constant 1.000000e+00 : f32
    %141 = vector.broadcast %cst_39 : f32 to vector<2x32xf32>
    %142 = arith.subf %141, %135 : vector<2x32xf32>
    %143 = arith.mulf %142, %140 : vector<2x32xf32>
    %144 = arith.mulf %135, %114 : vector<2x32xf32>
    %145 = arith.addf %143, %144 : vector<2x32xf32>
    %c6 = arith.constant 6 : index
    %c0_40 = arith.constant 0 : index
    %146 = vector.load %arg12[%c6, %c0_40] : memref<16x32xf32, #tpu.memory_space<vmem>>, vector<2x32xf32>
    tpu.vector_store %arg12[%c6, %c0_40], %145 {strides = array<i32>} : memref<16x32xf32, #tpu.memory_space<vmem>>, vector<2x32xf32>,
    %147 = vector.extract_strided_slice %16 {offsets = [8, 0], sizes = [2, 96], strides = [1, 1]} : vector<16x96xf32> to vector<2x96xf32>
    %cst_41 = arith.constant dense<0.000000e+00> : vector<2x96xf32>
    %148 = tpu.matmul %145, %18, %cst_41 {dimension_numbers = #tpu.dot_dimension_numbers<[1], [0], [0], [1], [0, 0, 1, 1], [], []>} : vector<2x32xf32>, vector<32x96xf32>, vector<2x96xf32> -> vector<2x96xf32>
    %149 = vector.broadcast %20 : vector<1x96xf32> to vector<2x96xf32>
    %150 = arith.addf %148, %149 : vector<2x96xf32>
    %151 = vector.extract_strided_slice %147 {offsets = [0, 0], sizes = [2, 32], strides = [1, 1]} : vector<2x96xf32> to vector<2x32xf32>
    %152 = vector.extract_strided_slice %150 {offsets = [0, 0], sizes = [2, 32], strides = [1, 1]} : vector<2x96xf32> to vector<2x32xf32>
    %153 = arith.addf %151, %152 : vector<2x32xf32>
    %154 = arith.negf %153 : vector<2x32xf32>
    %155 = math.exp %154 : vector<2x32xf32>
    %cst_42 = arith.constant 1.000000e+00 : f32
    %156 = vector.broadcast %cst_42 : f32 to vector<2x32xf32>
    %157 = arith.addf %156, %155 : vector<2x32xf32>
    %158 = arith.divf %156, %157 : vector<2x32xf32>
    %159 = vector.extract_strided_slice %147 {offsets = [0, 32], sizes = [2, 32], strides = [1, 1]} : vector<2x96xf32> to vector<2x32xf32>
    %160 = vector.extract_strided_slice %150 {offsets = [0, 32], sizes = [2, 32], strides = [1, 1]} : vector<2x96xf32> to vector<2x32xf32>
    %161 = arith.addf %159, %160 : vector<2x32xf32>
    %162 = arith.negf %161 : vector<2x32xf32>
    %163 = math.exp %162 : vector<2x32xf32>
    %cst_43 = arith.constant 1.000000e+00 : f32
    %164 = vector.broadcast %cst_43 : f32 to vector<2x32xf32>
    %165 = arith.addf %164, %163 : vector<2x32xf32>
    %166 = arith.divf %164, %165 : vector<2x32xf32>
    %167 = vector.extract_strided_slice %147 {offsets = [0, 64], sizes = [2, 32], strides = [1, 1]} : vector<2x96xf32> to vector<2x32xf32>
    %168 = vector.extract_strided_slice %150 {offsets = [0, 64], sizes = [2, 32], strides = [1, 1]} : vector<2x96xf32> to vector<2x32xf32>
    %169 = arith.mulf %158, %168 : vector<2x32xf32>
    %170 = arith.addf %167, %169 : vector<2x32xf32>
    %171 = math.tanh %170 : vector<2x32xf32>
    %cst_44 = arith.constant 1.000000e+00 : f32
    %172 = vector.broadcast %cst_44 : f32 to vector<2x32xf32>
    %173 = arith.subf %172, %166 : vector<2x32xf32>
    %174 = arith.mulf %173, %171 : vector<2x32xf32>
    %175 = arith.mulf %166, %145 : vector<2x32xf32>
    %176 = arith.addf %174, %175 : vector<2x32xf32>
    %c8 = arith.constant 8 : index
    %c0_45 = arith.constant 0 : index
    %177 = vector.load %arg12[%c8, %c0_45] : memref<16x32xf32, #tpu.memory_space<vmem>>, vector<2x32xf32>
    tpu.vector_store %arg12[%c8, %c0_45], %176 {strides = array<i32>} : memref<16x32xf32, #tpu.memory_space<vmem>>, vector<2x32xf32>,
    %178 = vector.extract_strided_slice %16 {offsets = [10, 0], sizes = [2, 96], strides = [1, 1]} : vector<16x96xf32> to vector<2x96xf32>
    %cst_46 = arith.constant dense<0.000000e+00> : vector<2x96xf32>
    %179 = tpu.matmul %176, %18, %cst_46 {dimension_numbers = #tpu.dot_dimension_numbers<[1], [0], [0], [1], [0, 0, 1, 1], [], []>} : vector<2x32xf32>, vector<32x96xf32>, vector<2x96xf32> -> vector<2x96xf32>
    %180 = vector.broadcast %20 : vector<1x96xf32> to vector<2x96xf32>
    %181 = arith.addf %179, %180 : vector<2x96xf32>
    %182 = vector.extract_strided_slice %178 {offsets = [0, 0], sizes = [2, 32], strides = [1, 1]} : vector<2x96xf32> to vector<2x32xf32>
    %183 = vector.extract_strided_slice %181 {offsets = [0, 0], sizes = [2, 32], strides = [1, 1]} : vector<2x96xf32> to vector<2x32xf32>
    %184 = arith.addf %182, %183 : vector<2x32xf32>
    %185 = arith.negf %184 : vector<2x32xf32>
    %186 = math.exp %185 : vector<2x32xf32>
    %cst_47 = arith.constant 1.000000e+00 : f32
    %187 = vector.broadcast %cst_47 : f32 to vector<2x32xf32>
    %188 = arith.addf %187, %186 : vector<2x32xf32>
    %189 = arith.divf %187, %188 : vector<2x32xf32>
    %190 = vector.extract_strided_slice %178 {offsets = [0, 32], sizes = [2, 32], strides = [1, 1]} : vector<2x96xf32> to vector<2x32xf32>
    %191 = vector.extract_strided_slice %181 {offsets = [0, 32], sizes = [2, 32], strides = [1, 1]} : vector<2x96xf32> to vector<2x32xf32>
    %192 = arith.addf %190, %191 : vector<2x32xf32>
    %193 = arith.negf %192 : vector<2x32xf32>
    %194 = math.exp %193 : vector<2x32xf32>
    %cst_48 = arith.constant 1.000000e+00 : f32
    %195 = vector.broadcast %cst_48 : f32 to vector<2x32xf32>
    %196 = arith.addf %195, %194 : vector<2x32xf32>
    %197 = arith.divf %195, %196 : vector<2x32xf32>
    %198 = vector.extract_strided_slice %178 {offsets = [0, 64], sizes = [2, 32], strides = [1, 1]} : vector<2x96xf32> to vector<2x32xf32>
    %199 = vector.extract_strided_slice %181 {offsets = [0, 64], sizes = [2, 32], strides = [1, 1]} : vector<2x96xf32> to vector<2x32xf32>
    %200 = arith.mulf %189, %199 : vector<2x32xf32>
    %201 = arith.addf %198, %200 : vector<2x32xf32>
    %202 = math.tanh %201 : vector<2x32xf32>
    %cst_49 = arith.constant 1.000000e+00 : f32
    %203 = vector.broadcast %cst_49 : f32 to vector<2x32xf32>
    %204 = arith.subf %203, %197 : vector<2x32xf32>
    %205 = arith.mulf %204, %202 : vector<2x32xf32>
    %206 = arith.mulf %197, %176 : vector<2x32xf32>
    %207 = arith.addf %205, %206 : vector<2x32xf32>
    %c10 = arith.constant 10 : index
    %c0_50 = arith.constant 0 : index
    %208 = vector.load %arg12[%c10, %c0_50] : memref<16x32xf32, #tpu.memory_space<vmem>>, vector<2x32xf32>
    tpu.vector_store %arg12[%c10, %c0_50], %207 {strides = array<i32>} : memref<16x32xf32, #tpu.memory_space<vmem>>, vector<2x32xf32>,
    %209 = vector.extract_strided_slice %16 {offsets = [12, 0], sizes = [2, 96], strides = [1, 1]} : vector<16x96xf32> to vector<2x96xf32>
    %cst_51 = arith.constant dense<0.000000e+00> : vector<2x96xf32>
    %210 = tpu.matmul %207, %18, %cst_51 {dimension_numbers = #tpu.dot_dimension_numbers<[1], [0], [0], [1], [0, 0, 1, 1], [], []>} : vector<2x32xf32>, vector<32x96xf32>, vector<2x96xf32> -> vector<2x96xf32>
    %211 = vector.broadcast %20 : vector<1x96xf32> to vector<2x96xf32>
    %212 = arith.addf %210, %211 : vector<2x96xf32>
    %213 = vector.extract_strided_slice %209 {offsets = [0, 0], sizes = [2, 32], strides = [1, 1]} : vector<2x96xf32> to vector<2x32xf32>
    %214 = vector.extract_strided_slice %212 {offsets = [0, 0], sizes = [2, 32], strides = [1, 1]} : vector<2x96xf32> to vector<2x32xf32>
    %215 = arith.addf %213, %214 : vector<2x32xf32>
    %216 = arith.negf %215 : vector<2x32xf32>
    %217 = math.exp %216 : vector<2x32xf32>
    %cst_52 = arith.constant 1.000000e+00 : f32
    %218 = vector.broadcast %cst_52 : f32 to vector<2x32xf32>
    %219 = arith.addf %218, %217 : vector<2x32xf32>
    %220 = arith.divf %218, %219 : vector<2x32xf32>
    %221 = vector.extract_strided_slice %209 {offsets = [0, 32], sizes = [2, 32], strides = [1, 1]} : vector<2x96xf32> to vector<2x32xf32>
    %222 = vector.extract_strided_slice %212 {offsets = [0, 32], sizes = [2, 32], strides = [1, 1]} : vector<2x96xf32> to vector<2x32xf32>
    %223 = arith.addf %221, %222 : vector<2x32xf32>
    %224 = arith.negf %223 : vector<2x32xf32>
    %225 = math.exp %224 : vector<2x32xf32>
    %cst_53 = arith.constant 1.000000e+00 : f32
    %226 = vector.broadcast %cst_53 : f32 to vector<2x32xf32>
    %227 = arith.addf %226, %225 : vector<2x32xf32>
    %228 = arith.divf %226, %227 : vector<2x32xf32>
    %229 = vector.extract_strided_slice %209 {offsets = [0, 64], sizes = [2, 32], strides = [1, 1]} : vector<2x96xf32> to vector<2x32xf32>
    %230 = vector.extract_strided_slice %212 {offsets = [0, 64], sizes = [2, 32], strides = [1, 1]} : vector<2x96xf32> to vector<2x32xf32>
    %231 = arith.mulf %220, %230 : vector<2x32xf32>
    %232 = arith.addf %229, %231 : vector<2x32xf32>
    %233 = math.tanh %232 : vector<2x32xf32>
    %cst_54 = arith.constant 1.000000e+00 : f32
    %234 = vector.broadcast %cst_54 : f32 to vector<2x32xf32>
    %235 = arith.subf %234, %228 : vector<2x32xf32>
    %236 = arith.mulf %235, %233 : vector<2x32xf32>
    %237 = arith.mulf %228, %207 : vector<2x32xf32>
    %238 = arith.addf %236, %237 : vector<2x32xf32>
    %c12 = arith.constant 12 : index
    %c0_55 = arith.constant 0 : index
    %239 = vector.load %arg12[%c12, %c0_55] : memref<16x32xf32, #tpu.memory_space<vmem>>, vector<2x32xf32>
    tpu.vector_store %arg12[%c12, %c0_55], %238 {strides = array<i32>} : memref<16x32xf32, #tpu.memory_space<vmem>>, vector<2x32xf32>,
    %240 = vector.extract_strided_slice %16 {offsets = [14, 0], sizes = [2, 96], strides = [1, 1]} : vector<16x96xf32> to vector<2x96xf32>
    %cst_56 = arith.constant dense<0.000000e+00> : vector<2x96xf32>
    %241 = tpu.matmul %238, %18, %cst_56 {dimension_numbers = #tpu.dot_dimension_numbers<[1], [0], [0], [1], [0, 0, 1, 1], [], []>} : vector<2x32xf32>, vector<32x96xf32>, vector<2x96xf32> -> vector<2x96xf32>
    %242 = vector.broadcast %20 : vector<1x96xf32> to vector<2x96xf32>
    %243 = arith.addf %241, %242 : vector<2x96xf32>
    %244 = vector.extract_strided_slice %240 {offsets = [0, 0], sizes = [2, 32], strides = [1, 1]} : vector<2x96xf32> to vector<2x32xf32>
    %245 = vector.extract_strided_slice %243 {offsets = [0, 0], sizes = [2, 32], strides = [1, 1]} : vector<2x96xf32> to vector<2x32xf32>
    %246 = arith.addf %244, %245 : vector<2x32xf32>
    %247 = arith.negf %246 : vector<2x32xf32>
    %248 = math.exp %247 : vector<2x32xf32>
    %cst_57 = arith.constant 1.000000e+00 : f32
    %249 = vector.broadcast %cst_57 : f32 to vector<2x32xf32>
    %250 = arith.addf %249, %248 : vector<2x32xf32>
    %251 = arith.divf %249, %250 : vector<2x32xf32>
    %252 = vector.extract_strided_slice %240 {offsets = [0, 32], sizes = [2, 32], strides = [1, 1]} : vector<2x96xf32> to vector<2x32xf32>
    %253 = vector.extract_strided_slice %243 {offsets = [0, 32], sizes = [2, 32], strides = [1, 1]} : vector<2x96xf32> to vector<2x32xf32>
    %254 = arith.addf %252, %253 : vector<2x32xf32>
    %255 = arith.negf %254 : vector<2x32xf32>
    %256 = math.exp %255 : vector<2x32xf32>
    %cst_58 = arith.constant 1.000000e+00 : f32
    %257 = vector.broadcast %cst_58 : f32 to vector<2x32xf32>
    %258 = arith.addf %257, %256 : vector<2x32xf32>
    %259 = arith.divf %257, %258 : vector<2x32xf32>
    %260 = vector.extract_strided_slice %240 {offsets = [0, 64], sizes = [2, 32], strides = [1, 1]} : vector<2x96xf32> to vector<2x32xf32>
    %261 = vector.extract_strided_slice %243 {offsets = [0, 64], sizes = [2, 32], strides = [1, 1]} : vector<2x96xf32> to vector<2x32xf32>
    %262 = arith.mulf %251, %261 : vector<2x32xf32>
    %263 = arith.addf %260, %262 : vector<2x32xf32>
    %264 = math.tanh %263 : vector<2x32xf32>
    %cst_59 = arith.constant 1.000000e+00 : f32
    %265 = vector.broadcast %cst_59 : f32 to vector<2x32xf32>
    %266 = arith.subf %265, %259 : vector<2x32xf32>
    %267 = arith.mulf %266, %264 : vector<2x32xf32>
    %268 = arith.mulf %259, %238 : vector<2x32xf32>
    %269 = arith.addf %267, %268 : vector<2x32xf32>
    %c14 = arith.constant 14 : index
    %c0_60 = arith.constant 0 : index
    %270 = vector.load %arg12[%c14, %c0_60] : memref<16x32xf32, #tpu.memory_space<vmem>>, vector<2x32xf32>
    tpu.vector_store %arg12[%c14, %c0_60], %269 {strides = array<i32>} : memref<16x32xf32, #tpu.memory_space<vmem>>, vector<2x32xf32>,
    %c0_61 = arith.constant 0 : index
    %c0_62 = arith.constant 0 : index
    %c0_63 = arith.constant 0 : index
    %271 = vector.load %arg11[%c0_61, %c0_62, %c0_63] : memref<2x2x32xf32, #tpu.memory_space<vmem>>, vector<1x2x32xf32>
    %272 = vector.shape_cast %271 : vector<1x2x32xf32> to vector<2x32xf32>
    %273 = vector.shape_cast %269 : vector<2x32xf32> to vector<1x2x32xf32>
    tpu.vector_store %arg11[%c0_61, %c0_62, %c0_63], %273 {strides = array<i32>} : memref<2x2x32xf32, #tpu.memory_space<vmem>>, vector<1x2x32xf32>,
    %c0_64 = arith.constant 0 : index
    %c0_65 = arith.constant 0 : index
    %274 = vector.load %arg12[%c0_64, %c0_65] : memref<16x32xf32, #tpu.memory_space<vmem>>, vector<16x32xf32>
    %c1 = arith.constant 1 : index
    %c0_66 = arith.constant 0 : index
    %c0_67 = arith.constant 0 : index
    %275 = vector.load %arg4[%c1, %c0_66, %c0_67] : memref<2x32x96xf32, #tpu.memory_space<vmem>>, vector<1x32x96xf32>
    %276 = vector.shape_cast %275 : vector<1x32x96xf32> to vector<32x96xf32>
    %cst_68 = arith.constant dense<0.000000e+00> : vector<16x96xf32>
    %277 = tpu.matmul %274, %276, %cst_68 {dimension_numbers = #tpu.dot_dimension_numbers<[1], [0], [0], [1], [0, 0, 1, 1], [], []>} : vector<16x32xf32>, vector<32x96xf32>, vector<16x96xf32> -> vector<16x96xf32>
    %c1_69 = arith.constant 1 : index
    %c0_70 = arith.constant 0 : index
    %c0_71 = arith.constant 0 : index
    %278 = vector.load %arg6[%c1_69, %c0_70, %c0_71] : memref<2x1x96xf32, #tpu.memory_space<vmem>>, vector<1x1x96xf32>
    %279 = vector.shape_cast %278 : vector<1x1x96xf32> to vector<1x96xf32>
    %280 = vector.broadcast %279 : vector<1x96xf32> to vector<16x96xf32>
    %281 = arith.addf %277, %280 : vector<16x96xf32>
    %c1_72 = arith.constant 1 : index
    %c0_73 = arith.constant 0 : index
    %c0_74 = arith.constant 0 : index
    %282 = vector.load %arg5[%c1_72, %c0_73, %c0_74] : memref<2x32x96xf32, #tpu.memory_space<vmem>>, vector<1x32x96xf32>
    %283 = vector.shape_cast %282 : vector<1x32x96xf32> to vector<32x96xf32>
    %c1_75 = arith.constant 1 : index
    %c0_76 = arith.constant 0 : index
    %c0_77 = arith.constant 0 : index
    %284 = vector.load %arg7[%c1_75, %c0_76, %c0_77] : memref<2x1x96xf32, #tpu.memory_space<vmem>>, vector<1x1x96xf32>
    %285 = vector.shape_cast %284 : vector<1x1x96xf32> to vector<1x96xf32>
    %c1_78 = arith.constant 1 : index
    %c0_79 = arith.constant 0 : index
    %c0_80 = arith.constant 0 : index
    %286 = vector.load %arg3[%c1_78, %c0_79, %c0_80] : memref<2x2x32xf32, #tpu.memory_space<vmem>>, vector<1x2x32xf32>
    %287 = vector.shape_cast %286 : vector<1x2x32xf32> to vector<2x32xf32>
    %288 = vector.extract_strided_slice %281 {offsets = [0, 0], sizes = [2, 96], strides = [1, 1]} : vector<16x96xf32> to vector<2x96xf32>
    %cst_81 = arith.constant dense<0.000000e+00> : vector<2x96xf32>
    %289 = tpu.matmul %287, %283, %cst_81 {dimension_numbers = #tpu.dot_dimension_numbers<[1], [0], [0], [1], [0, 0, 1, 1], [], []>} : vector<2x32xf32>, vector<32x96xf32>, vector<2x96xf32> -> vector<2x96xf32>
    %290 = vector.broadcast %285 : vector<1x96xf32> to vector<2x96xf32>
    %291 = arith.addf %289, %290 : vector<2x96xf32>
    %292 = vector.extract_strided_slice %288 {offsets = [0, 0], sizes = [2, 32], strides = [1, 1]} : vector<2x96xf32> to vector<2x32xf32>
    %293 = vector.extract_strided_slice %291 {offsets = [0, 0], sizes = [2, 32], strides = [1, 1]} : vector<2x96xf32> to vector<2x32xf32>
    %294 = arith.addf %292, %293 : vector<2x32xf32>
    %295 = arith.negf %294 : vector<2x32xf32>
    %296 = math.exp %295 : vector<2x32xf32>
    %cst_82 = arith.constant 1.000000e+00 : f32
    %297 = vector.broadcast %cst_82 : f32 to vector<2x32xf32>
    %298 = arith.addf %297, %296 : vector<2x32xf32>
    %299 = arith.divf %297, %298 : vector<2x32xf32>
    %300 = vector.extract_strided_slice %288 {offsets = [0, 32], sizes = [2, 32], strides = [1, 1]} : vector<2x96xf32> to vector<2x32xf32>
    %301 = vector.extract_strided_slice %291 {offsets = [0, 32], sizes = [2, 32], strides = [1, 1]} : vector<2x96xf32> to vector<2x32xf32>
    %302 = arith.addf %300, %301 : vector<2x32xf32>
    %303 = arith.negf %302 : vector<2x32xf32>
    %304 = math.exp %303 : vector<2x32xf32>
    %cst_83 = arith.constant 1.000000e+00 : f32
    %305 = vector.broadcast %cst_83 : f32 to vector<2x32xf32>
    %306 = arith.addf %305, %304 : vector<2x32xf32>
    %307 = arith.divf %305, %306 : vector<2x32xf32>
    %308 = vector.extract_strided_slice %288 {offsets = [0, 64], sizes = [2, 32], strides = [1, 1]} : vector<2x96xf32> to vector<2x32xf32>
    %309 = vector.extract_strided_slice %291 {offsets = [0, 64], sizes = [2, 32], strides = [1, 1]} : vector<2x96xf32> to vector<2x32xf32>
    %310 = arith.mulf %299, %309 : vector<2x32xf32>
    %311 = arith.addf %308, %310 : vector<2x32xf32>
    %312 = math.tanh %311 : vector<2x32xf32>
    %cst_84 = arith.constant 1.000000e+00 : f32
    %313 = vector.broadcast %cst_84 : f32 to vector<2x32xf32>
    %314 = arith.subf %313, %307 : vector<2x32xf32>
    %315 = arith.mulf %314, %312 : vector<2x32xf32>
    %316 = arith.mulf %307, %287 : vector<2x32xf32>
    %317 = arith.addf %315, %316 : vector<2x32xf32>
    %c0_85 = arith.constant 0 : index
    %c0_86 = arith.constant 0 : index
    %318 = vector.load %arg12[%c0_85, %c0_86] : memref<16x32xf32, #tpu.memory_space<vmem>>, vector<2x32xf32>
    tpu.vector_store %arg12[%c0_85, %c0_86], %317 {strides = array<i32>} : memref<16x32xf32, #tpu.memory_space<vmem>>, vector<2x32xf32>,
    %319 = vector.extract_strided_slice %281 {offsets = [2, 0], sizes = [2, 96], strides = [1, 1]} : vector<16x96xf32> to vector<2x96xf32>
    %cst_87 = arith.constant dense<0.000000e+00> : vector<2x96xf32>
    %320 = tpu.matmul %317, %283, %cst_87 {dimension_numbers = #tpu.dot_dimension_numbers<[1], [0], [0], [1], [0, 0, 1, 1], [], []>} : vector<2x32xf32>, vector<32x96xf32>, vector<2x96xf32> -> vector<2x96xf32>
    %321 = vector.broadcast %285 : vector<1x96xf32> to vector<2x96xf32>
    %322 = arith.addf %320, %321 : vector<2x96xf32>
    %323 = vector.extract_strided_slice %319 {offsets = [0, 0], sizes = [2, 32], strides = [1, 1]} : vector<2x96xf32> to vector<2x32xf32>
    %324 = vector.extract_strided_slice %322 {offsets = [0, 0], sizes = [2, 32], strides = [1, 1]} : vector<2x96xf32> to vector<2x32xf32>
    %325 = arith.addf %323, %324 : vector<2x32xf32>
    %326 = arith.negf %325 : vector<2x32xf32>
    %327 = math.exp %326 : vector<2x32xf32>
    %cst_88 = arith.constant 1.000000e+00 : f32
    %328 = vector.broadcast %cst_88 : f32 to vector<2x32xf32>
    %329 = arith.addf %328, %327 : vector<2x32xf32>
    %330 = arith.divf %328, %329 : vector<2x32xf32>
    %331 = vector.extract_strided_slice %319 {offsets = [0, 32], sizes = [2, 32], strides = [1, 1]} : vector<2x96xf32> to vector<2x32xf32>
    %332 = vector.extract_strided_slice %322 {offsets = [0, 32], sizes = [2, 32], strides = [1, 1]} : vector<2x96xf32> to vector<2x32xf32>
    %333 = arith.addf %331, %332 : vector<2x32xf32>
    %334 = arith.negf %333 : vector<2x32xf32>
    %335 = math.exp %334 : vector<2x32xf32>
    %cst_89 = arith.constant 1.000000e+00 : f32
    %336 = vector.broadcast %cst_89 : f32 to vector<2x32xf32>
    %337 = arith.addf %336, %335 : vector<2x32xf32>
    %338 = arith.divf %336, %337 : vector<2x32xf32>
    %339 = vector.extract_strided_slice %319 {offsets = [0, 64], sizes = [2, 32], strides = [1, 1]} : vector<2x96xf32> to vector<2x32xf32>
    %340 = vector.extract_strided_slice %322 {offsets = [0, 64], sizes = [2, 32], strides = [1, 1]} : vector<2x96xf32> to vector<2x32xf32>
    %341 = arith.mulf %330, %340 : vector<2x32xf32>
    %342 = arith.addf %339, %341 : vector<2x32xf32>
    %343 = math.tanh %342 : vector<2x32xf32>
    %cst_90 = arith.constant 1.000000e+00 : f32
    %344 = vector.broadcast %cst_90 : f32 to vector<2x32xf32>
    %345 = arith.subf %344, %338 : vector<2x32xf32>
    %346 = arith.mulf %345, %343 : vector<2x32xf32>
    %347 = arith.mulf %338, %317 : vector<2x32xf32>
    %348 = arith.addf %346, %347 : vector<2x32xf32>
    %c2_91 = arith.constant 2 : index
    %c0_92 = arith.constant 0 : index
    %349 = vector.load %arg12[%c2_91, %c0_92] : memref<16x32xf32, #tpu.memory_space<vmem>>, vector<2x32xf32>
    tpu.vector_store %arg12[%c2_91, %c0_92], %348 {strides = array<i32>} : memref<16x32xf32, #tpu.memory_space<vmem>>, vector<2x32xf32>,
    %350 = vector.extract_strided_slice %281 {offsets = [4, 0], sizes = [2, 96], strides = [1, 1]} : vector<16x96xf32> to vector<2x96xf32>
    %cst_93 = arith.constant dense<0.000000e+00> : vector<2x96xf32>
    %351 = tpu.matmul %348, %283, %cst_93 {dimension_numbers = #tpu.dot_dimension_numbers<[1], [0], [0], [1], [0, 0, 1, 1], [], []>} : vector<2x32xf32>, vector<32x96xf32>, vector<2x96xf32> -> vector<2x96xf32>
    %352 = vector.broadcast %285 : vector<1x96xf32> to vector<2x96xf32>
    %353 = arith.addf %351, %352 : vector<2x96xf32>
    %354 = vector.extract_strided_slice %350 {offsets = [0, 0], sizes = [2, 32], strides = [1, 1]} : vector<2x96xf32> to vector<2x32xf32>
    %355 = vector.extract_strided_slice %353 {offsets = [0, 0], sizes = [2, 32], strides = [1, 1]} : vector<2x96xf32> to vector<2x32xf32>
    %356 = arith.addf %354, %355 : vector<2x32xf32>
    %357 = arith.negf %356 : vector<2x32xf32>
    %358 = math.exp %357 : vector<2x32xf32>
    %cst_94 = arith.constant 1.000000e+00 : f32
    %359 = vector.broadcast %cst_94 : f32 to vector<2x32xf32>
    %360 = arith.addf %359, %358 : vector<2x32xf32>
    %361 = arith.divf %359, %360 : vector<2x32xf32>
    %362 = vector.extract_strided_slice %350 {offsets = [0, 32], sizes = [2, 32], strides = [1, 1]} : vector<2x96xf32> to vector<2x32xf32>
    %363 = vector.extract_strided_slice %353 {offsets = [0, 32], sizes = [2, 32], strides = [1, 1]} : vector<2x96xf32> to vector<2x32xf32>
    %364 = arith.addf %362, %363 : vector<2x32xf32>
    %365 = arith.negf %364 : vector<2x32xf32>
    %366 = math.exp %365 : vector<2x32xf32>
    %cst_95 = arith.constant 1.000000e+00 : f32
    %367 = vector.broadcast %cst_95 : f32 to vector<2x32xf32>
    %368 = arith.addf %367, %366 : vector<2x32xf32>
    %369 = arith.divf %367, %368 : vector<2x32xf32>
    %370 = vector.extract_strided_slice %350 {offsets = [0, 64], sizes = [2, 32], strides = [1, 1]} : vector<2x96xf32> to vector<2x32xf32>
    %371 = vector.extract_strided_slice %353 {offsets = [0, 64], sizes = [2, 32], strides = [1, 1]} : vector<2x96xf32> to vector<2x32xf32>
    %372 = arith.mulf %361, %371 : vector<2x32xf32>
    %373 = arith.addf %370, %372 : vector<2x32xf32>
    %374 = math.tanh %373 : vector<2x32xf32>
    %cst_96 = arith.constant 1.000000e+00 : f32
    %375 = vector.broadcast %cst_96 : f32 to vector<2x32xf32>
    %376 = arith.subf %375, %369 : vector<2x32xf32>
    %377 = arith.mulf %376, %374 : vector<2x32xf32>
    %378 = arith.mulf %369, %348 : vector<2x32xf32>
    %379 = arith.addf %377, %378 : vector<2x32xf32>
    %c4_97 = arith.constant 4 : index
    %c0_98 = arith.constant 0 : index
    %380 = vector.load %arg12[%c4_97, %c0_98] : memref<16x32xf32, #tpu.memory_space<vmem>>, vector<2x32xf32>
    tpu.vector_store %arg12[%c4_97, %c0_98], %379 {strides = array<i32>} : memref<16x32xf32, #tpu.memory_space<vmem>>, vector<2x32xf32>,
    %381 = vector.extract_strided_slice %281 {offsets = [6, 0], sizes = [2, 96], strides = [1, 1]} : vector<16x96xf32> to vector<2x96xf32>
    %cst_99 = arith.constant dense<0.000000e+00> : vector<2x96xf32>
    %382 = tpu.matmul %379, %283, %cst_99 {dimension_numbers = #tpu.dot_dimension_numbers<[1], [0], [0], [1], [0, 0, 1, 1], [], []>} : vector<2x32xf32>, vector<32x96xf32>, vector<2x96xf32> -> vector<2x96xf32>
    %383 = vector.broadcast %285 : vector<1x96xf32> to vector<2x96xf32>
    %384 = arith.addf %382, %383 : vector<2x96xf32>
    %385 = vector.extract_strided_slice %381 {offsets = [0, 0], sizes = [2, 32], strides = [1, 1]} : vector<2x96xf32> to vector<2x32xf32>
    %386 = vector.extract_strided_slice %384 {offsets = [0, 0], sizes = [2, 32], strides = [1, 1]} : vector<2x96xf32> to vector<2x32xf32>
    %387 = arith.addf %385, %386 : vector<2x32xf32>
    %388 = arith.negf %387 : vector<2x32xf32>
    %389 = math.exp %388 : vector<2x32xf32>
    %cst_100 = arith.constant 1.000000e+00 : f32
    %390 = vector.broadcast %cst_100 : f32 to vector<2x32xf32>
    %391 = arith.addf %390, %389 : vector<2x32xf32>
    %392 = arith.divf %390, %391 : vector<2x32xf32>
    %393 = vector.extract_strided_slice %381 {offsets = [0, 32], sizes = [2, 32], strides = [1, 1]} : vector<2x96xf32> to vector<2x32xf32>
    %394 = vector.extract_strided_slice %384 {offsets = [0, 32], sizes = [2, 32], strides = [1, 1]} : vector<2x96xf32> to vector<2x32xf32>
    %395 = arith.addf %393, %394 : vector<2x32xf32>
    %396 = arith.negf %395 : vector<2x32xf32>
    %397 = math.exp %396 : vector<2x32xf32>
    %cst_101 = arith.constant 1.000000e+00 : f32
    %398 = vector.broadcast %cst_101 : f32 to vector<2x32xf32>
    %399 = arith.addf %398, %397 : vector<2x32xf32>
    %400 = arith.divf %398, %399 : vector<2x32xf32>
    %401 = vector.extract_strided_slice %381 {offsets = [0, 64], sizes = [2, 32], strides = [1, 1]} : vector<2x96xf32> to vector<2x32xf32>
    %402 = vector.extract_strided_slice %384 {offsets = [0, 64], sizes = [2, 32], strides = [1, 1]} : vector<2x96xf32> to vector<2x32xf32>
    %403 = arith.mulf %392, %402 : vector<2x32xf32>
    %404 = arith.addf %401, %403 : vector<2x32xf32>
    %405 = math.tanh %404 : vector<2x32xf32>
    %cst_102 = arith.constant 1.000000e+00 : f32
    %406 = vector.broadcast %cst_102 : f32 to vector<2x32xf32>
    %407 = arith.subf %406, %400 : vector<2x32xf32>
    %408 = arith.mulf %407, %405 : vector<2x32xf32>
    %409 = arith.mulf %400, %379 : vector<2x32xf32>
    %410 = arith.addf %408, %409 : vector<2x32xf32>
    %c6_103 = arith.constant 6 : index
    %c0_104 = arith.constant 0 : index
    %411 = vector.load %arg12[%c6_103, %c0_104] : memref<16x32xf32, #tpu.memory_space<vmem>>, vector<2x32xf32>
    tpu.vector_store %arg12[%c6_103, %c0_104], %410 {strides = array<i32>} : memref<16x32xf32, #tpu.memory_space<vmem>>, vector<2x32xf32>,
    %412 = vector.extract_strided_slice %281 {offsets = [8, 0], sizes = [2, 96], strides = [1, 1]} : vector<16x96xf32> to vector<2x96xf32>
    %cst_105 = arith.constant dense<0.000000e+00> : vector<2x96xf32>
    %413 = tpu.matmul %410, %283, %cst_105 {dimension_numbers = #tpu.dot_dimension_numbers<[1], [0], [0], [1], [0, 0, 1, 1], [], []>} : vector<2x32xf32>, vector<32x96xf32>, vector<2x96xf32> -> vector<2x96xf32>
    %414 = vector.broadcast %285 : vector<1x96xf32> to vector<2x96xf32>
    %415 = arith.addf %413, %414 : vector<2x96xf32>
    %416 = vector.extract_strided_slice %412 {offsets = [0, 0], sizes = [2, 32], strides = [1, 1]} : vector<2x96xf32> to vector<2x32xf32>
    %417 = vector.extract_strided_slice %415 {offsets = [0, 0], sizes = [2, 32], strides = [1, 1]} : vector<2x96xf32> to vector<2x32xf32>
    %418 = arith.addf %416, %417 : vector<2x32xf32>
    %419 = arith.negf %418 : vector<2x32xf32>
    %420 = math.exp %419 : vector<2x32xf32>
    %cst_106 = arith.constant 1.000000e+00 : f32
    %421 = vector.broadcast %cst_106 : f32 to vector<2x32xf32>
    %422 = arith.addf %421, %420 : vector<2x32xf32>
    %423 = arith.divf %421, %422 : vector<2x32xf32>
    %424 = vector.extract_strided_slice %412 {offsets = [0, 32], sizes = [2, 32], strides = [1, 1]} : vector<2x96xf32> to vector<2x32xf32>
    %425 = vector.extract_strided_slice %415 {offsets = [0, 32], sizes = [2, 32], strides = [1, 1]} : vector<2x96xf32> to vector<2x32xf32>
    %426 = arith.addf %424, %425 : vector<2x32xf32>
    %427 = arith.negf %426 : vector<2x32xf32>
    %428 = math.exp %427 : vector<2x32xf32>
    %cst_107 = arith.constant 1.000000e+00 : f32
    %429 = vector.broadcast %cst_107 : f32 to vector<2x32xf32>
    %430 = arith.addf %429, %428 : vector<2x32xf32>
    %431 = arith.divf %429, %430 : vector<2x32xf32>
    %432 = vector.extract_strided_slice %412 {offsets = [0, 64], sizes = [2, 32], strides = [1, 1]} : vector<2x96xf32> to vector<2x32xf32>
    %433 = vector.extract_strided_slice %415 {offsets = [0, 64], sizes = [2, 32], strides = [1, 1]} : vector<2x96xf32> to vector<2x32xf32>
    %434 = arith.mulf %423, %433 : vector<2x32xf32>
    %435 = arith.addf %432, %434 : vector<2x32xf32>
    %436 = math.tanh %435 : vector<2x32xf32>
    %cst_108 = arith.constant 1.000000e+00 : f32
    %437 = vector.broadcast %cst_108 : f32 to vector<2x32xf32>
    %438 = arith.subf %437, %431 : vector<2x32xf32>
    %439 = arith.mulf %438, %436 : vector<2x32xf32>
    %440 = arith.mulf %431, %410 : vector<2x32xf32>
    %441 = arith.addf %439, %440 : vector<2x32xf32>
    %c8_109 = arith.constant 8 : index
    %c0_110 = arith.constant 0 : index
    %442 = vector.load %arg12[%c8_109, %c0_110] : memref<16x32xf32, #tpu.memory_space<vmem>>, vector<2x32xf32>
    tpu.vector_store %arg12[%c8_109, %c0_110], %441 {strides = array<i32>} : memref<16x32xf32, #tpu.memory_space<vmem>>, vector<2x32xf32>,
    %443 = vector.extract_strided_slice %281 {offsets = [10, 0], sizes = [2, 96], strides = [1, 1]} : vector<16x96xf32> to vector<2x96xf32>
    %cst_111 = arith.constant dense<0.000000e+00> : vector<2x96xf32>
    %444 = tpu.matmul %441, %283, %cst_111 {dimension_numbers = #tpu.dot_dimension_numbers<[1], [0], [0], [1], [0, 0, 1, 1], [], []>} : vector<2x32xf32>, vector<32x96xf32>, vector<2x96xf32> -> vector<2x96xf32>
    %445 = vector.broadcast %285 : vector<1x96xf32> to vector<2x96xf32>
    %446 = arith.addf %444, %445 : vector<2x96xf32>
    %447 = vector.extract_strided_slice %443 {offsets = [0, 0], sizes = [2, 32], strides = [1, 1]} : vector<2x96xf32> to vector<2x32xf32>
    %448 = vector.extract_strided_slice %446 {offsets = [0, 0], sizes = [2, 32], strides = [1, 1]} : vector<2x96xf32> to vector<2x32xf32>
    %449 = arith.addf %447, %448 : vector<2x32xf32>
    %450 = arith.negf %449 : vector<2x32xf32>
    %451 = math.exp %450 : vector<2x32xf32>
    %cst_112 = arith.constant 1.000000e+00 : f32
    %452 = vector.broadcast %cst_112 : f32 to vector<2x32xf32>
    %453 = arith.addf %452, %451 : vector<2x32xf32>
    %454 = arith.divf %452, %453 : vector<2x32xf32>
    %455 = vector.extract_strided_slice %443 {offsets = [0, 32], sizes = [2, 32], strides = [1, 1]} : vector<2x96xf32> to vector<2x32xf32>
    %456 = vector.extract_strided_slice %446 {offsets = [0, 32], sizes = [2, 32], strides = [1, 1]} : vector<2x96xf32> to vector<2x32xf32>
    %457 = arith.addf %455, %456 : vector<2x32xf32>
    %458 = arith.negf %457 : vector<2x32xf32>
    %459 = math.exp %458 : vector<2x32xf32>
    %cst_113 = arith.constant 1.000000e+00 : f32
    %460 = vector.broadcast %cst_113 : f32 to vector<2x32xf32>
    %461 = arith.addf %460, %459 : vector<2x32xf32>
    %462 = arith.divf %460, %461 : vector<2x32xf32>
    %463 = vector.extract_strided_slice %443 {offsets = [0, 64], sizes = [2, 32], strides = [1, 1]} : vector<2x96xf32> to vector<2x32xf32>
    %464 = vector.extract_strided_slice %446 {offsets = [0, 64], sizes = [2, 32], strides = [1, 1]} : vector<2x96xf32> to vector<2x32xf32>
    %465 = arith.mulf %454, %464 : vector<2x32xf32>
    %466 = arith.addf %463, %465 : vector<2x32xf32>
    %467 = math.tanh %466 : vector<2x32xf32>
    %cst_114 = arith.constant 1.000000e+00 : f32
    %468 = vector.broadcast %cst_114 : f32 to vector<2x32xf32>
    %469 = arith.subf %468, %462 : vector<2x32xf32>
    %470 = arith.mulf %469, %467 : vector<2x32xf32>
    %471 = arith.mulf %462, %441 : vector<2x32xf32>
    %472 = arith.addf %470, %471 : vector<2x32xf32>
    %c10_115 = arith.constant 10 : index
    %c0_116 = arith.constant 0 : index
    %473 = vector.load %arg12[%c10_115, %c0_116] : memref<16x32xf32, #tpu.memory_space<vmem>>, vector<2x32xf32>
    tpu.vector_store %arg12[%c10_115, %c0_116], %472 {strides = array<i32>} : memref<16x32xf32, #tpu.memory_space<vmem>>, vector<2x32xf32>,
    %474 = vector.extract_strided_slice %281 {offsets = [12, 0], sizes = [2, 96], strides = [1, 1]} : vector<16x96xf32> to vector<2x96xf32>
    %cst_117 = arith.constant dense<0.000000e+00> : vector<2x96xf32>
    %475 = tpu.matmul %472, %283, %cst_117 {dimension_numbers = #tpu.dot_dimension_numbers<[1], [0], [0], [1], [0, 0, 1, 1], [], []>} : vector<2x32xf32>, vector<32x96xf32>, vector<2x96xf32> -> vector<2x96xf32>
    %476 = vector.broadcast %285 : vector<1x96xf32> to vector<2x96xf32>
    %477 = arith.addf %475, %476 : vector<2x96xf32>
    %478 = vector.extract_strided_slice %474 {offsets = [0, 0], sizes = [2, 32], strides = [1, 1]} : vector<2x96xf32> to vector<2x32xf32>
    %479 = vector.extract_strided_slice %477 {offsets = [0, 0], sizes = [2, 32], strides = [1, 1]} : vector<2x96xf32> to vector<2x32xf32>
    %480 = arith.addf %478, %479 : vector<2x32xf32>
    %481 = arith.negf %480 : vector<2x32xf32>
    %482 = math.exp %481 : vector<2x32xf32>
    %cst_118 = arith.constant 1.000000e+00 : f32
    %483 = vector.broadcast %cst_118 : f32 to vector<2x32xf32>
    %484 = arith.addf %483, %482 : vector<2x32xf32>
    %485 = arith.divf %483, %484 : vector<2x32xf32>
    %486 = vector.extract_strided_slice %474 {offsets = [0, 32], sizes = [2, 32], strides = [1, 1]} : vector<2x96xf32> to vector<2x32xf32>
    %487 = vector.extract_strided_slice %477 {offsets = [0, 32], sizes = [2, 32], strides = [1, 1]} : vector<2x96xf32> to vector<2x32xf32>
    %488 = arith.addf %486, %487 : vector<2x32xf32>
    %489 = arith.negf %488 : vector<2x32xf32>
    %490 = math.exp %489 : vector<2x32xf32>
    %cst_119 = arith.constant 1.000000e+00 : f32
    %491 = vector.broadcast %cst_119 : f32 to vector<2x32xf32>
    %492 = arith.addf %491, %490 : vector<2x32xf32>
    %493 = arith.divf %491, %492 : vector<2x32xf32>
    %494 = vector.extract_strided_slice %474 {offsets = [0, 64], sizes = [2, 32], strides = [1, 1]} : vector<2x96xf32> to vector<2x32xf32>
    %495 = vector.extract_strided_slice %477 {offsets = [0, 64], sizes = [2, 32], strides = [1, 1]} : vector<2x96xf32> to vector<2x32xf32>
    %496 = arith.mulf %485, %495 : vector<2x32xf32>
    %497 = arith.addf %494, %496 : vector<2x32xf32>
    %498 = math.tanh %497 : vector<2x32xf32>
    %cst_120 = arith.constant 1.000000e+00 : f32
    %499 = vector.broadcast %cst_120 : f32 to vector<2x32xf32>
    %500 = arith.subf %499, %493 : vector<2x32xf32>
    %501 = arith.mulf %500, %498 : vector<2x32xf32>
    %502 = arith.mulf %493, %472 : vector<2x32xf32>
    %503 = arith.addf %501, %502 : vector<2x32xf32>
    %c12_121 = arith.constant 12 : index
    %c0_122 = arith.constant 0 : index
    %504 = vector.load %arg12[%c12_121, %c0_122] : memref<16x32xf32, #tpu.memory_space<vmem>>, vector<2x32xf32>
    tpu.vector_store %arg12[%c12_121, %c0_122], %503 {strides = array<i32>} : memref<16x32xf32, #tpu.memory_space<vmem>>, vector<2x32xf32>,
    %505 = vector.extract_strided_slice %281 {offsets = [14, 0], sizes = [2, 96], strides = [1, 1]} : vector<16x96xf32> to vector<2x96xf32>
    %cst_123 = arith.constant dense<0.000000e+00> : vector<2x96xf32>
    %506 = tpu.matmul %503, %283, %cst_123 {dimension_numbers = #tpu.dot_dimension_numbers<[1], [0], [0], [1], [0, 0, 1, 1], [], []>} : vector<2x32xf32>, vector<32x96xf32>, vector<2x96xf32> -> vector<2x96xf32>
    %507 = vector.broadcast %285 : vector<1x96xf32> to vector<2x96xf32>
    %508 = arith.addf %506, %507 : vector<2x96xf32>
    %509 = vector.extract_strided_slice %505 {offsets = [0, 0], sizes = [2, 32], strides = [1, 1]} : vector<2x96xf32> to vector<2x32xf32>
    %510 = vector.extract_strided_slice %508 {offsets = [0, 0], sizes = [2, 32], strides = [1, 1]} : vector<2x96xf32> to vector<2x32xf32>
    %511 = arith.addf %509, %510 : vector<2x32xf32>
    %512 = arith.negf %511 : vector<2x32xf32>
    %513 = math.exp %512 : vector<2x32xf32>
    %cst_124 = arith.constant 1.000000e+00 : f32
    %514 = vector.broadcast %cst_124 : f32 to vector<2x32xf32>
    %515 = arith.addf %514, %513 : vector<2x32xf32>
    %516 = arith.divf %514, %515 : vector<2x32xf32>
    %517 = vector.extract_strided_slice %505 {offsets = [0, 32], sizes = [2, 32], strides = [1, 1]} : vector<2x96xf32> to vector<2x32xf32>
    %518 = vector.extract_strided_slice %508 {offsets = [0, 32], sizes = [2, 32], strides = [1, 1]} : vector<2x96xf32> to vector<2x32xf32>
    %519 = arith.addf %517, %518 : vector<2x32xf32>
    %520 = arith.negf %519 : vector<2x32xf32>
    %521 = math.exp %520 : vector<2x32xf32>
    %cst_125 = arith.constant 1.000000e+00 : f32
    %522 = vector.broadcast %cst_125 : f32 to vector<2x32xf32>
    %523 = arith.addf %522, %521 : vector<2x32xf32>
    %524 = arith.divf %522, %523 : vector<2x32xf32>
    %525 = vector.extract_strided_slice %505 {offsets = [0, 64], sizes = [2, 32], strides = [1, 1]} : vector<2x96xf32> to vector<2x32xf32>
    %526 = vector.extract_strided_slice %508 {offsets = [0, 64], sizes = [2, 32], strides = [1, 1]} : vector<2x96xf32> to vector<2x32xf32>
    %527 = arith.mulf %516, %526 : vector<2x32xf32>
    %528 = arith.addf %525, %527 : vector<2x32xf32>
    %529 = math.tanh %528 : vector<2x32xf32>
    %cst_126 = arith.constant 1.000000e+00 : f32
    %530 = vector.broadcast %cst_126 : f32 to vector<2x32xf32>
    %531 = arith.subf %530, %524 : vector<2x32xf32>
    %532 = arith.mulf %531, %529 : vector<2x32xf32>
    %533 = arith.mulf %524, %503 : vector<2x32xf32>
    %534 = arith.addf %532, %533 : vector<2x32xf32>
    %c14_127 = arith.constant 14 : index
    %c0_128 = arith.constant 0 : index
    %535 = vector.load %arg12[%c14_127, %c0_128] : memref<16x32xf32, #tpu.memory_space<vmem>>, vector<2x32xf32>
    tpu.vector_store %arg12[%c14_127, %c0_128], %534 {strides = array<i32>} : memref<16x32xf32, #tpu.memory_space<vmem>>, vector<2x32xf32>,
    %c1_129 = arith.constant 1 : index
    %c0_130 = arith.constant 0 : index
    %c0_131 = arith.constant 0 : index
    %536 = vector.load %arg11[%c1_129, %c0_130, %c0_131] : memref<2x2x32xf32, #tpu.memory_space<vmem>>, vector<1x2x32xf32>
    %537 = vector.shape_cast %536 : vector<1x2x32xf32> to vector<2x32xf32>
    %538 = vector.shape_cast %534 : vector<2x32xf32> to vector<1x2x32xf32>
    tpu.vector_store %arg11[%c1_129, %c0_130, %c0_131], %538 {strides = array<i32>} : memref<2x2x32xf32, #tpu.memory_space<vmem>>, vector<1x2x32xf32>,
    %c0_132 = arith.constant 0 : index
    %c0_133 = arith.constant 0 : index
    %539 = vector.load %arg12[%c0_132, %c0_133] : memref<16x32xf32, #tpu.memory_space<vmem>>, vector<16x32xf32>
    %c0_134 = arith.constant 0 : index
    %c0_135 = arith.constant 0 : index
    %540 = vector.load %arg8[%c0_134, %c0_135] : memref<32x64xf32, #tpu.memory_space<vmem>>, vector<32x64xf32>
    %cst_136 = arith.constant dense<0.000000e+00> : vector<16x64xf32>
    %541 = tpu.matmul %539, %540, %cst_136 {dimension_numbers = #tpu.dot_dimension_numbers<[1], [0], [0], [1], [0, 0, 1, 1], [], []>} : vector<16x32xf32>, vector<32x64xf32>, vector<16x64xf32> -> vector<16x64xf32>
    %c0_137 = arith.constant 0 : index
    %c0_138 = arith.constant 0 : index
    %542 = vector.load %arg9[%c0_137, %c0_138] : memref<1x64xf32, #tpu.memory_space<vmem>>, vector<1x64xf32>
    %543 = vector.broadcast %542 : vector<1x64xf32> to vector<16x64xf32>
    %544 = arith.addf %541, %543 : vector<16x64xf32>
    %545 = vector.shape_cast %544 : vector<16x64xf32> to vector<2x8x64xf32>
    %cst_139 = arith.constant dense<0xFF800000> : vector<8x64xf32>
    %546 = vector.multi_reduction <maximumf>, %545, %cst_139 [0] : vector<2x8x64xf32> to vector<8x64xf32>
    %547 = vector.shape_cast %546 : vector<8x64xf32> to vector<1x8x64xf32>
    %548 = vector.broadcast %547 : vector<1x8x64xf32> to vector<2x8x64xf32>
    %549 = arith.subf %545, %548 : vector<2x8x64xf32>
    %550 = math.exp %549 : vector<2x8x64xf32>
    %cst_140 = arith.constant dense<0.000000e+00> : vector<8x64xf32>
    %551 = vector.multi_reduction <add>, %550, %cst_140 [0] : vector<2x8x64xf32> to vector<8x64xf32>
    %552 = vector.shape_cast %551 : vector<8x64xf32> to vector<1x8x64xf32>
    %553 = vector.broadcast %552 : vector<1x8x64xf32> to vector<2x8x64xf32>
    %554 = arith.divf %550, %553 : vector<2x8x64xf32>
    %c0_141 = arith.constant 0 : index
    %c0_142 = arith.constant 0 : index
    %c0_143 = arith.constant 0 : index
    %555 = vector.load %arg10[%c0_141, %c0_142, %c0_143] : memref<2x8x64xf32, #tpu.memory_space<vmem>>, vector<2x8x64xf32>
    tpu.vector_store %arg10[%c0_141, %c0_142, %c0_143], %554 {strides = array<i32>} : memref<2x8x64xf32, #tpu.memory_space<vmem>>, vector<2x8x64xf32>,
    return
  }
  func.func @transform_0(%arg0: i32) -> (i32, i32) {
    %c0_i32 = arith.constant 0 : i32
    %c0_i32_0 = arith.constant 0 : i32
    %c0_i32_1 = arith.constant 0 : i32
    return %c0_i32, %c0_i32_0 : i32, i32
  }
  func.func @transform_1(%arg0: i32) -> (i32, i32) {
    %c0_i32 = arith.constant 0 : i32
    %c0_i32_0 = arith.constant 0 : i32
    %c0_i32_1 = arith.constant 0 : i32
    return %c0_i32, %c0_i32_0 : i32, i32
  }
  func.func @transform_2(%arg0: i32) -> (i32, i32, i32) {
    %c0_i32 = arith.constant 0 : i32
    %c0_i32_0 = arith.constant 0 : i32
    %c0_i32_1 = arith.constant 0 : i32
    %c0_i32_2 = arith.constant 0 : i32
    return %c0_i32, %c0_i32_0, %c0_i32_1 : i32, i32, i32
  }
  func.func @transform_3(%arg0: i32) -> (i32, i32, i32) {
    %c0_i32 = arith.constant 0 : i32
    %c0_i32_0 = arith.constant 0 : i32
    %c0_i32_1 = arith.constant 0 : i32
    %c0_i32_2 = arith.constant 0 : i32
    return %c0_i32, %c0_i32_0, %c0_i32_1 : i32, i32, i32
  }
  func.func @transform_4(%arg0: i32) -> (i32, i32, i32) {
    %c0_i32 = arith.constant 0 : i32
    %c0_i32_0 = arith.constant 0 : i32
    %c0_i32_1 = arith.constant 0 : i32
    %c0_i32_2 = arith.constant 0 : i32
    return %c0_i32, %c0_i32_0, %c0_i32_1 : i32, i32, i32
  }
  func.func @transform_5(%arg0: i32) -> (i32, i32, i32) {
    %c0_i32 = arith.constant 0 : i32
    %c0_i32_0 = arith.constant 0 : i32
    %c0_i32_1 = arith.constant 0 : i32
    %c0_i32_2 = arith.constant 0 : i32
    return %c0_i32, %c0_i32_0, %c0_i32_1 : i32, i32, i32
  }
  func.func @transform_6(%arg0: i32) -> (i32, i32, i32) {
    %c0_i32 = arith.constant 0 : i32
    %c0_i32_0 = arith.constant 0 : i32
    %c0_i32_1 = arith.constant 0 : i32
    %c0_i32_2 = arith.constant 0 : i32
    return %c0_i32, %c0_i32_0, %c0_i32_1 : i32, i32, i32
  }
  func.func @transform_7(%arg0: i32) -> (i32, i32) {
    %c0_i32 = arith.constant 0 : i32
    %c0_i32_0 = arith.constant 0 : i32
    %c0_i32_1 = arith.constant 0 : i32
    return %c0_i32, %c0_i32_0 : i32, i32
  }
  func.func @transform_8(%arg0: i32) -> (i32, i32) {
    %c0_i32 = arith.constant 0 : i32
    %c0_i32_0 = arith.constant 0 : i32
    %c0_i32_1 = arith.constant 0 : i32
    return %c0_i32, %c0_i32_0 : i32, i32
  }
  func.func @transform_9(%arg0: i32) -> (i32, i32, i32) {
    %c0_i32 = arith.constant 0 : i32
    %c0_i32_0 = arith.constant 0 : i32
    %c0_i32_1 = arith.constant 0 : i32
    %c0_i32_2 = arith.constant 0 : i32
    return %c0_i32, %c0_i32_0, %c0_i32_1 : i32, i32, i32
  }
  func.func @transform_10(%arg0: i32) -> (i32, i32, i32) {
    %c0_i32 = arith.constant 0 : i32
    %c0_i32_0 = arith.constant 0 : i32
    %c0_i32_1 = arith.constant 0 : i32
    %c0_i32_2 = arith.constant 0 : i32
    return %c0_i32, %c0_i32_0, %c0_i32_1 : i32, i32, i32
  }
}

</mosaic_0001>

<bundles_post_ra>
// kernel: decoder_forward.1
= control target key start
LH: loop header
LB: loop body
LE: loop exit
PB: predicated region body
PF: predicated region fallthrough
CT: control target
= control target key end

     0   :  { %16 = vsyncpa [#allocation4], 0  ;;  %s2291_s0 = inlined_call_operand.vmem [shape: s32[16,1], index: 0, kind: input, shape index: {}]   ;;  %s2292_s1 = inlined_call_operand.hbm [shape: f32[64,32], index: 1, kind: input, shape index: {}]   ;;  %s2293_s2 = inlined_call_operand.vmem [shape: f32[2,2,32], index: 2, kind: input, shape index: {}]   ;;  %s2294_s3 = inlined_call_operand.hbm [shape: f32[2,32,96], index: 3, kind: input, shape index: {}]   ;;  %s2295_s4 = inlined_call_operand.hbm [shape: f32[2,32,96], index: 4, kind: input, shape index: {}]   ;;  %s2296_s5 = inlined_call_operand.vmem [shape: f32[2,1,96], index: 5, kind: input, shape index: {}]   ;;  %s2297_s6 = inlined_call_operand.vmem [shape: f32[2,1,96], index: 6, kind: input, shape index: {}]   ;;  %s2298_s7 = inlined_call_operand.hbm [shape: f32[32,64], index: 7, kind: input, shape index: {}]   ;;  %s2299_s8 = inlined_call_operand.vmem [shape: f32[1,64], index: 8, kind: input, shape index: {}]   ;;  %s2300_s9 = inlined_call_operand.hbm [shape: f32[2,8,64], index: 9, kind: output, shape index: {0}]   ;;  %s2301_s10 = inlined_call_operand.hbm [shape: f32[2,2,32], index: 10, kind: output, shape index: {1}]  }
   0x1   :  { %17 = vsyncpa [#allocation7], 0 }
   0x2   :  { %18 = vsyncpa [#allocation10], 0 }
   0x3   :  { %19 = vsyncpa [#allocation5], 0 }
   0x4   :  { %20 = vsyncpa [#allocation13], 0  ;;  %s42_s15 = sshll.u32 %s2294_s3, 4  ;;  %s1836_s16 = smov [#allocation6]   ;;  %s43_s15 = int_to_ptr.hbm [resolvable:$true] %s42_s15 }
   0x5   :  { %s44_s17 = sshll.u32 %s1836_s16, 4  ;;  %s27_s20 = sshll.u32 %s2292_s1, 4  ;;  %s45_s17 = int_to_ptr.vmem [resolvable:$true] %s44_s17  ;;  %s28_s20 = int_to_ptr.hbm [resolvable:$true] %s27_s20 }
   0x6   :  { %s1837_s21 = smov 128   ;;  %s1838_s22 = smov 8  }
   0x7   :  { %50 = dma.hbm_to_vmem [thread:$0]  %s43_s15, 1024, %s45_s17, [#allocation7], %s1837_s21, %s1837_s21, %s1838_s22  }
   0x8   :  { %s1839_s23 = smov [#allocation3]   ;;  %s55_s3 = sshll.u32 %s2295_s4, 4  ;;  %s56_s3 = int_to_ptr.hbm [resolvable:$true] %s55_s3 }
   0x9   :  { %s29_s24 = sshll.u32 %s1839_s23, 4  ;;  %s72_s28 = sshll.u32 %s2298_s7, 4  ;;  %s30_s24 = int_to_ptr.vmem [resolvable:$true] %s29_s24  ;;  %s73_s28 = int_to_ptr.hbm [resolvable:$true] %s72_s28 }
   0xa   :  { %35 = dma.hbm_to_vmem [thread:$0]  %s28_s20, 1024, %s30_s24, [#allocation4], %s1837_s21, %s1837_s21, %s1838_s22  }
   0xb   :  { %s1840_s29 = smov [#allocation8]   ;;  %s1841_s11 = smov [#allocation9]  }
   0xc   :  { %s57_s30 = sshll.u32 %s1840_s29, 4  ;;  %s74_s4 = sshll.u32 %s1841_s11, 4  ;;  %s58_s30 = int_to_ptr.vmem [resolvable:$true] %s57_s30  ;;  %s75_s4 = int_to_ptr.vmem [resolvable:$true] %s74_s4 }
   0xd   :  { %63 = dma.hbm_to_vmem [thread:$0]  %s56_s3, 1024, %s58_s30, [#allocation7], %s1837_s21, %s1837_s21, %s1838_s22  }
   0xe   :  { %80 = dma.hbm_to_vmem [thread:$0]  %s73_s28, 512, %s75_s4, [#allocation10], %s1837_s21, %s1837_s21, %s1838_s22  }
   0xf   :  { %1826 = dma.done.wait [#allocation4], 1024  }
  0x10   :  { %1827 = vsyncadd [#allocation4], 4294966272 }
  0x11   :  { %1828 = dma.done.wait [#allocation7], 2048  }
  0x12   :  { %1829 = vsyncadd [#allocation7], 4294965248 }
  0x13   :  { %1830 = dma.done.wait [#allocation10], 512  }
  0x14   :  { %1831 = vsyncadd [#allocation10], 4294966784  ;;  %v1842_v0 = vmov 0   ;;  %v99_v1 = vld [vmem:[%s2291_s0] sm:$0xff]  ;;  %v122_v2 = vld [vmem:[#allocation3 + $0x38] sm:$0xff]  ;;  %vm163_vm0 = vcmask 261120   ;;  %v101_v17 = vlaneseq }
  0x15   :  { %1573 = vset.pattern.permute.xlu0 %v1842_v0  ;;  %1574 = vset.pattern.permute.xlu2 %v1842_v0  ;;  %v121_v3 = vld [vmem:[#allocation3 + $0x30] sm:$0xff]  ;;  %v120_v4 = vld [vmem:[#allocation3 + $0x28] sm:$0xff]  ;;  %v119_v5 = vld [vmem:[#allocation3 + $0x20] sm:$0xff]  ;;  %vm123_vm1 = vcmask 523264   ;;  %v1843_v20 = vmov 0.0   ;;  %s1844_s15 = smov 32  }
  0x16   :  { %104 = vperm.xlu0 %1573, %v99_v1   ;;  %138 = vmatpush.msra.mxu0 %v122_v2  ;;  %v118_v6 = vld [vmem:[#allocation3 + $0x18] sm:$0xff]  ;;  %v117_v7 = vld [vmem:[#allocation3 + $0x10] sm:$0xff]  ;;  %v116_v8 = vld [vmem:[#allocation3 + $0x8] sm:$0xff]  ;;  %v1968_v18 = vand.u32 127, %v101_v17  ;;  %s1845_s18 = smov 64   ;;  %s1846_s23 = smov 96  }
  0x17   :  { %v115_v9 = vld [vmem:[#allocation3] sm:$0xff]  ;;  %v1932_v10 = vld [vmem:[#allocation8 + $0x18] sm:$0xff]  ;;  %v1934_v11 = vld [vmem:[#allocation8 + $0x10] sm:$0xff]  ;;  %vm271_vm7 = vcmask 254976   ;;  %s1494_s30 = sshll.u32 %s2301_s10, 4  ;;  %s1848_s11 = smov 2   ;;  %s1495_s30 = int_to_ptr.hbm [resolvable:$true] %s1494_s30 }
  0x18   :  { %139 = vmatpush.msra.mxu0 %v121_v3  ;;  %217 = vmatpush.msra.mxu2 %v1932_v10  ;;  %v158_v12 = vld [vmem:[#allocation6 + $0x18] sm:$0xff]  ;;  %v1938_v13 = vld [vmem:[#allocation8 + $0x8] sm:$0xff]  ;;  %v157_v14 = vld [vmem:[#allocation6 + $0x10] sm:$0xff]  ;;  %s1481_s14 = sshll.u32 %s2300_s9, 4  ;;  %s1482_s14 = int_to_ptr.hbm [resolvable:$true] %s1481_s14 }
  0x19   :  { %287 = vmatpush.msra.mxu3 %v1932_v10  ;;  %182 = vmatpush.msra.mxu1 %v158_v12  ;;  %v1943_v15 = vld [vmem:[#allocation8] sm:$0xff]  ;;  %v198_v16 = vld [vmem:[%s2293_s2] sm:$0x3]  ;;  %v156_v22 = vld [vmem:[#allocation6 + $0x8] sm:$0xff] }
  0x1a   :  { %140 = vmatpush.msra.mxu0 %v120_v4  ;;  %218 = vmatpush.msra.mxu2 %v1934_v11  ;;  %v155_v23 = vld [vmem:[#allocation6] sm:$0xff]  ;;  %v1981_v24 = vld [vmem:[%s2297_s6] ss:$0 sm:$0xff] }
  0x1b   :  { %288 = vmatpush.msra.mxu3 %v1934_v11  ;;  %183 = vmatpush.msra.mxu1 %v157_v14  ;;  %v1989_v29 = vld [vmem:[%s2296_s5] ss:$0 sm:$0xff] }
  0x1c   :  { %141 = vmatpush.msra.mxu0 %v119_v5  ;;  %219 = vmatpush.msra.mxu2 %v1938_v13 }
  0x1d   :  { %289 = vmatpush.msra.mxu3 %v1938_v13  ;;  %262 = vrot.lane.b32.xlu2 %v198_v16, %s1844_s15 }
  0x1e   :  { %142 = vmatpush.msra.mxu0 %v118_v6  ;;  %220 = vmatpush.msra.mxu2 %v1943_v15 }
  0x1f   :  { %290 = vmatpush.msra.mxu3 %v1943_v15  ;;  %1520 = vmatmul.msk.f32.vlgmr.msra.gmra.mxu2 %vm163_vm0, %v198_v16 }
  0x20   :  { %143 = vmatpush.msra.mxu0 %v117_v7  ;;  %361 = vmatpush.msrb.mxu2 %v1932_v10 }
  0x21   :  { %435 = vmatpush.msrb.mxu3 %v1932_v10  ;;  %184 = vmatpush.msra.mxu1 %v156_v22 }
  0x22   :  { %144 = vmatpush.msra.mxu0 %v116_v8  ;;  %362 = vmatpush.msrb.mxu2 %v1934_v11 }
  0x23   :  { %436 = vmatpush.msrb.mxu3 %v1934_v11  ;;  %185 = vmatpush.msra.mxu1 %v155_v23 }
  0x24   :  { %145 = vmatpush.msra.mxu0 %v115_v9  ;;  %363 = vmatpush.msrb.mxu2 %v1938_v13 }
  0x25   :  { %437 = vmatpush.msrb.mxu3 %v1938_v13  ;;  %509 = vmatpush.msrb.mxu1 %v1932_v10 }
  0x26   :  { %722 = vmatpush.msrb.mxu0 %v1932_v10  ;;  %364 = vmatpush.msrb.mxu2 %v1943_v15 }
  0x27   :  { %438 = vmatpush.msrb.mxu3 %v1943_v15  ;;  %510 = vmatpush.msrb.mxu1 %v1934_v11 }
  0x28   :  { %723 = vmatpush.msrb.mxu0 %v1934_v11  ;;  %576 = vmatpush.msra.mxu2 %v1932_v10 }
  0x29   :  { %511 = vmatpush.msrb.mxu1 %v1938_v13 }
  0x2a   :  { %724 = vmatpush.msrb.mxu0 %v1938_v13  ;;  %577 = vmatpush.msra.mxu2 %v1934_v11 }
  0x2b   :  { %512 = vmatpush.msrb.mxu1 %v1943_v15 }
  0x2c   :  { %725 = vmatpush.msrb.mxu0 %v1943_v15  ;;  %578 = vmatpush.msra.mxu2 %v1938_v13 }
  0x2e   :  { %579 = vmatpush.msra.mxu2 %v1943_v15 }
  0x77   :  { %v263_v51 = vpop.permute.xlu2 %262 }
  0x88   :  { %v105_v19 = vpop.permute.xlu0 %104 }
  0x89   :  { %vm109_vm2 = vcmp.eq.s32.totalorder %v105_v19, %v1968_v18 }
  0x8a   :  { %v1514_v21 = vsel %vm109_vm2, 1.0, %v1843_v20 }
  0x8b   :  { %1516 = vmatmul.msk.f32.vlgmr.msra.gmra.mxu0 %vm123_vm1, %v1514_v21 }
  0xa2   :  { %v222_v25 = vpop.f32.mrf.mxu2 }
  0xa3   :  { %v223_v26 = vadd.f32 %v1981_v24, %v222_v25 }
  0xa5   :  { %246 = vrot.lane.b32.xlu0 %v223_v26, %s1845_s18 }
 0x108   :  { %v147_v27 = vpop.f32.mrf.mxu0 }
 0x109   :  { %v153_v28 = vmax.f32 %v147_v27, 0.0 }
 0x10b   :  { %1518 = vmatmul.msk.f32.vlgmr.msra.gmra.mxu1 %vm163_vm0, %v153_v28 }
 0x117   :  { %v247_v44 = vpop.permute.xlu0 %246 }
 0x188   :  { %v187_v30 = vpop.f32.mrf.mxu1 }
 0x189   :  { %v1992_v31 = vadd.f32 %v1989_v29, %v187_v30 }
 0x18b   :  { %v225_v32 = vadd.f32 %v223_v26, %v1992_v31 }
 0x18d   :  { %v1521_v33 = vmul.f32 -1.442695, %v225_v32 }
 0x18f   :  { %1580 = vpow2.f32 %v1521_v33 }
 0x195   :  { %v1581_v34 = vpop.eup %1580 }
 0x196   :  { %v229_v35 = vadd.f32 1.0, %v1581_v34 }
 0x198   :  { %1582 = vrcp.f32 %v229_v35  ;;  %v241_v39 = vand.u32 2147483648, %v229_v35  ;;  %v239_v41 = vand.u32 2147483647, %v229_v35  ;;  %vm235_vm4 = vweird.f32 %v229_v35 }
 0x19a   :  { %v242_v43 = vor.u32 1.1754944e-38, %v241_v39  ;;  %vm240_vm6 = vcmp.eq.f32.partialorder %v239_v41, 8.507059e+37 }
 0x19e   :  { %v1583_v36 = vpop.eup %1582 }
 0x19f   :  { %v231_v37 = vmul.f32 %v1583_v36, %v229_v35  ;;  %vm236_vm3 = vweird.f32 %v1583_v36 }
 0x1a0   :  { %vm237_vm5 = vmor %vm235_vm4, %vm236_vm3 }
 0x1a1   :  { %v232_v38 = vsub.f32 1.0, %v231_v37 }
 0x1a3   :  { %v233_v40 = vmul.f32 %v1583_v36, %v232_v38 }
 0x1a5   :  { %v234_v42 = vadd.f32 %v1583_v36, %v233_v40 }
 0x1a7   :  { %v238_v45 = vsel %vm237_vm5, %v1583_v36, %v234_v42 }
 0x1a8   :  { %v243_v46 = vsel %vm240_vm6, %v242_v43, %v238_v45 }
 0x1a9   :  { %v249_v47 = vmul.f32 %v247_v44, %v243_v46  ;;  %v256_v52 = vsub.f32 1.0, %v243_v46  ;;  %v265_v54 = vmul.f32 %v263_v51, %v243_v46 }
 0x1ab   :  { %251 = vrot.lane.b32.xlu1 %v249_v47, %s1845_s18 }
 0x21d   :  { %v252_v48 = vpop.permute.xlu1 %251 }
 0x21e   :  { %v254_v49 = vadd.f32 %v252_v48, %v1992_v31 }
 0x220   :  { %1584 = vtanh.f32 %v254_v49 }
 0x226   :  { %v1585_v50 = vpop.eup %1584 }
 0x227   :  { %258 = vrot.lane.b32.xlu1 %v1585_v50, %s1846_s23 }
 0x299   :  { %v259_v53 = vpop.permute.xlu1 %258 }
 0x29a   :  { %v261_v55 = vmul.f32 %v259_v53, %v256_v52 }
 0x29c   :  { %v266_v56 = vadd.f32 %v265_v54, %v261_v55 }
 0x29e   :  { %268 = vrot.lane.b32.xlu2 %v266_v56, %s1846_s23  ;;  %v334_v16 = vrot.slane %v266_v56, 6 }
 0x2f8   :  { %v269_v57 = vpop.permute.xlu2 %268 }
 0x2f9   :  { %272 = vst.msk [vmem:[#allocation2] sm:$0x3] %vm271_vm7, %v269_v57  ;;  %1522 = vmatmul.msk.f32.vlgmr.msra.gmra.mxu3 %vm163_vm0, %v269_v57 }
 0x2fa   :  { %649 = vmatpush.msra.mxu3 %v1932_v10 }
 0x2fc   :  { %650 = vmatpush.msra.mxu3 %v1934_v11 }
 0x2fe   :  { %651 = vmatpush.msra.mxu3 %v1938_v13 }
 0x300   :  { %652 = vmatpush.msra.mxu3 %v1943_v15 }
 0x37c   :  { %v292_v58 = vpop.f32.mrf.mxu3 }
 0x37d   :  { %v293_v59 = vadd.f32 %v1981_v24, %v292_v58 }
 0x37f   :  { %v296_v60 = vrot.slane %v293_v59, 6 }
 0x381   :  { %318 = vrot.lane.b32.xlu0 %v296_v60, %s1845_s18  ;;  %v298_v61 = vadd.f32 %v296_v60, %v1992_v31 }
 0x383   :  { %v1523_v62 = vmul.f32 -1.442695, %v298_v61 }
 0x385   :  { %1586 = vpow2.f32 %v1523_v62 }
 0x38b   :  { %v1587_v63 = vpop.eup %1586 }
 0x38c   :  { %v302_v0 = vadd.f32 1.0, %v1587_v63 }
 0x38e   :  { %1588 = vrcp.f32 %v302_v0  ;;  %v314_v6 = vand.u32 2147483648, %v302_v0  ;;  %vm308_vm9 = vweird.f32 %v302_v0  ;;  %v312_v7 = vand.u32 2147483647, %v302_v0 }
 0x390   :  { %v315_v9 = vor.u32 1.1754944e-38, %v314_v6  ;;  %vm313_vm11 = vcmp.eq.f32.partialorder %v312_v7, 8.507059e+37 }
 0x394   :  { %v1589_v1 = vpop.eup %1588 }
 0x395   :  { %v304_v2 = vmul.f32 %v1589_v1, %v302_v0  ;;  %vm309_vm8 = vweird.f32 %v1589_v1 }
 0x396   :  { %vm310_vm10 = vmor %vm308_vm9, %vm309_vm8 }
 0x397   :  { %v305_v3 = vsub.f32 1.0, %v304_v2  ;;  %v100_v2 = vld [vmem:[%s2291_s0 + $0x8] sm:$0xff] }
 0x399   :  { %v306_v4 = vmul.f32 %v1589_v1, %v305_v3 }
 0x39b   :  { %v307_v5 = vadd.f32 %v1589_v1, %v306_v4 }
 0x39d   :  { %v311_v8 = vsel %vm310_vm10, %v1589_v1, %v307_v5 }
 0x39e   :  { %v316_v11 = vsel %vm313_vm11, %v315_v9, %v311_v8 }
 0x39f   :  { %v328_v17 = vsub.f32 1.0, %v316_v11  ;;  %v336_v22 = vmul.f32 %v334_v16, %v316_v11 }
 0x3f3   :  { %v319_v10 = vpop.permute.xlu0 %318 }
 0x3f4   :  { %v321_v12 = vmul.f32 %v319_v10, %v316_v11 }
 0x3f6   :  { %323 = vrot.lane.b32.xlu1 %v321_v12, %s1845_s18 }
 0x468   :  { %v324_v13 = vpop.permute.xlu1 %323 }
 0x469   :  { %v326_v14 = vadd.f32 %v324_v13, %v1992_v31 }
 0x46b   :  { %1590 = vtanh.f32 %v326_v14 }
 0x471   :  { %v1591_v15 = vpop.eup %1590 }
 0x472   :  { %330 = vrot.lane.b32.xlu2 %v1591_v15, %s1846_s23 }
 0x4cc   :  { %v331_v19 = vpop.permute.xlu2 %330 }
 0x4cd   :  { %v333_v21 = vmul.f32 %v331_v19, %v328_v17 }
 0x4cf   :  { %v2011_v23 = vadd.f32 %v336_v22, %v333_v21 }
 0x4d1   :  { %v344_v25 = vrot.slane %v2011_v23, 2  ;;  %v408_v52 = vrot.slane %v2011_v23, 6 }
 0x4d3   :  { %345 = vrot.lane.b32.xlu0 %v344_v25, %s1846_s23 }
 0x545   :  { %v346_v26 = vpop.permute.xlu0 %345 }
 0x546   :  { %1524 = vmatmul.msk.f32.vlgmr.msrb.gmra.mxu2 %vm163_vm0, %v346_v26 }
 0x5c9   :  { %v366_v27 = vpop.f32.mrf.mxu2 }
 0x5ca   :  { %v367_v28 = vadd.f32 %v1981_v24, %v366_v27 }
 0x5cc   :  { %v370_v30 = vrot.slane %v367_v28, 4 }
 0x5ce   :  { %392 = vrot.lane.b32.xlu1 %v370_v30, %s1845_s18  ;;  %v372_v32 = vadd.f32 %v370_v30, %v1992_v31 }
 0x5d0   :  { %v1525_v33 = vmul.f32 -1.442695, %v372_v32 }
 0x5d2   :  { %1592 = vpow2.f32 %v1525_v33 }
 0x5d8   :  { %v1593_v34 = vpop.eup %1592 }
 0x5d9   :  { %v376_v35 = vadd.f32 1.0, %v1593_v34 }
 0x5db   :  { %1594 = vrcp.f32 %v376_v35  ;;  %v388_v41 = vand.u32 2147483648, %v376_v35  ;;  %vm382_vm13 = vweird.f32 %v376_v35  ;;  %v386_v42 = vand.u32 2147483647, %v376_v35 }
 0x5dd   :  { %v389_v44 = vor.u32 1.1754944e-38, %v388_v41  ;;  %vm387_vm15 = vcmp.eq.f32.partialorder %v386_v42, 8.507059e+37 }
 0x5e1   :  { %v1595_v36 = vpop.eup %1594 }
 0x5e2   :  { %v378_v37 = vmul.f32 %v1595_v36, %v376_v35  ;;  %vm383_vm12 = vweird.f32 %v1595_v36 }
 0x5e3   :  { %vm384_vm14 = vmor %vm382_vm13, %vm383_vm12  ;;  %vm342_vm12 = vcmask 257026   ;;  %vm416_vm13 = vcmask 259076  }
 0x5e4   :  { %v379_v38 = vsub.f32 1.0, %v378_v37 }
 0x5e6   :  { %v380_v39 = vmul.f32 %v1595_v36, %v379_v38 }
 0x5e8   :  { %v381_v40 = vadd.f32 %v1595_v36, %v380_v39 }
 0x5ea   :  { %v385_v43 = vsel %vm384_vm14, %v1595_v36, %v381_v40  ;;  %vm490_vm14 = vcmask 261126  }
 0x5eb   :  { %v390_v46 = vsel %vm387_vm15, %v389_v44, %v385_v43 }
 0x5ec   :  { %v402_v51 = vsub.f32 1.0, %v390_v46  ;;  %v410_v54 = vmul.f32 %v408_v52, %v390_v46 }
 0x640   :  { %v393_v45 = vpop.permute.xlu1 %392 }
 0x641   :  { %v395_v47 = vmul.f32 %v393_v45, %v390_v46 }
 0x643   :  { %397 = vrot.lane.b32.xlu2 %v395_v47, %s1845_s18 }
 0x64b   :  { %107 = vperm.xlu2 %1574, %v100_v2   ;;  %v784_v2 = vld [vmem:[#allocation6 + $0x30] sm:$0xff] }
 0x69d   :  { %v398_v48 = vpop.permute.xlu2 %397 }
 0x69e   :  { %v400_v49 = vadd.f32 %v398_v48, %v1992_v31 }
 0x6a0   :  { %1596 = vtanh.f32 %v400_v49 }
 0x6a5   :  { %v108_v15 = vpop.permute.xlu2 %107 }
 0x6a6   :  { %v1597_v50 = vpop.eup %1596  ;;  %vm110_vm6 = vcmp.eq.s32.totalorder %v108_v15, %v1968_v18 }
 0x6a7   :  { %404 = vrot.lane.b32.xlu0 %v1597_v50, %s1846_s23  ;;  %v1515_v16 = vsel %vm110_vm6, 1.0, %v1843_v20 }
 0x6a8   :  { %1517 = vmatmul.msk.f32.gmra.mxu0 %vm123_vm1, %v1515_v16 }
 0x719   :  { %v405_v53 = vpop.permute.xlu0 %404 }
 0x71a   :  { %v407_v55 = vmul.f32 %v405_v53, %v402_v51 }
 0x71c   :  { %v2023_v56 = vadd.f32 %v410_v54, %v407_v55 }
 0x71e   :  { %v418_v57 = vrot.slane %v2023_v56, 4  ;;  %v482_v25 = vrot.slane %v2023_v56, 6 }
 0x720   :  { %419 = vrot.lane.b32.xlu1 %v418_v57, %s1846_s23 }
 0x725   :  { %v150_v18 = vpop.f32.mrf.mxu0 }
 0x726   :  { %v154_v20 = vmax.f32 %v150_v18, 0.0 }
 0x728   :  { %1519 = vmatmul.msk.f32.gmra.mxu1 %vm163_vm0, %v154_v20 }
 0x792   :  { %v420_v58 = vpop.permute.xlu1 %419 }
 0x793   :  { %1526 = vmatmul.msk.f32.vlgmr.msrb.gmra.mxu3 %vm163_vm0, %v420_v58 }
 0x816   :  { %v440_v59 = vpop.f32.mrf.mxu3 }
 0x817   :  { %v441_v60 = vadd.f32 %v1981_v24, %v440_v59 }
 0x819   :  { %v444_v61 = vrot.slane %v441_v60, 2 }
 0x81b   :  { %466 = vrot.lane.b32.xlu0 %v444_v61, %s1845_s18  ;;  %v446_v62 = vadd.f32 %v444_v61, %v1992_v31 }
 0x81d   :  { %v1527_v63 = vmul.f32 -1.442695, %v446_v62  ;;  %v2064_v62 = vld [vmem:[#allocation8 + $0x38] sm:$0xff] }
 0x81e   :  { %847 = vmatpush.msrb.mxu2 %v2064_v62  ;;  %916 = vmatpush.msrb.mxu3 %v2064_v62 }
 0x81f   :  { %1598 = vpow2.f32 %v1527_v63  ;;  %v2066_v63 = vld [vmem:[#allocation8 + $0x30] sm:$0xff]  ;;  %989 = vmatpush.msra.mxu0 %v2064_v62 }
 0x820   :  { %848 = vmatpush.msrb.mxu2 %v2066_v63  ;;  %917 = vmatpush.msrb.mxu3 %v2066_v63 }
 0x821   :  { %990 = vmatpush.msra.mxu0 %v2066_v63 }
 0x825   :  { %v1599_v0 = vpop.eup %1598 }
 0x826   :  { %v450_v1 = vadd.f32 1.0, %v1599_v0  ;;  %v2075_v0 = vld [vmem:[#allocation8 + $0x20] sm:$0xff] }
 0x828   :  { %1600 = vrcp.f32 %v450_v1  ;;  %v462_v8 = vand.u32 2147483648, %v450_v1  ;;  %vm456_vm3 = vweird.f32 %v450_v1  ;;  %v460_v9 = vand.u32 2147483647, %v450_v1 }
 0x82a   :  { %v463_v11 = vor.u32 1.1754944e-38, %v462_v8  ;;  %vm461_vm5 = vcmp.eq.f32.partialorder %v460_v9, 8.507059e+37 }
 0x82e   :  { %v1601_v3 = vpop.eup %1600 }
 0x82f   :  { %v452_v4 = vmul.f32 %v1601_v3, %v450_v1  ;;  %vm457_vm2 = vweird.f32 %v1601_v3  ;;  %v785_v1 = vld [vmem:[#allocation6 + $0x38] sm:$0xff] }
 0x830   :  { %vm458_vm4 = vmor %vm456_vm3, %vm457_vm2  ;;  %809 = vmatpush.msra.mxu1 %v785_v1 }
 0x831   :  { %v453_v5 = vsub.f32 1.0, %v452_v4  ;;  %v782_v4 = vld [vmem:[#allocation6 + $0x20] sm:$0xff] }
 0x832   :  { %810 = vmatpush.msra.mxu1 %v784_v2 }
 0x833   :  { %v454_v6 = vmul.f32 %v1601_v3, %v453_v5 }
 0x835   :  { %v455_v7 = vadd.f32 %v1601_v3, %v454_v6  ;;  %v2095_v6 = vld [vmem:[%s2293_s2 + $0x2] sm:$0x3] }
 0x837   :  { %v459_v10 = vsel %vm458_vm4, %v1601_v3, %v455_v7  ;;  %v783_v3 = vld [vmem:[#allocation6 + $0x28] sm:$0xff] }
 0x838   :  { %v464_v13 = vsel %vm461_vm5, %v463_v11, %v459_v10  ;;  %811 = vmatpush.msra.mxu1 %v783_v3 }
 0x839   :  { %v476_v22 = vsub.f32 1.0, %v464_v13  ;;  %v484_v27 = vmul.f32 %v482_v25, %v464_v13 }
 0x83a   :  { %812 = vmatpush.msra.mxu1 %v782_v4 }
 0x88d   :  { %v467_v12 = vpop.permute.xlu0 %466 }
 0x88e   :  { %v469_v14 = vmul.f32 %v467_v12, %v464_v13  ;;  %v2113_v13 = vld [vmem:[%s2297_s6 + $0x1] ss:$0 sm:$0xff] }
 0x890   :  { %471 = vrot.lane.b32.xlu1 %v469_v14, %s1845_s18 }
 0x902   :  { %v472_v17 = vpop.permute.xlu1 %471 }
 0x903   :  { %v474_v19 = vadd.f32 %v472_v17, %v1992_v31  ;;  %v190_v31 = vpop.f32.mrf.mxu1 }
 0x904   :  { %v2047_v36 = vadd.f32 %v1989_v29, %v190_v31 }
 0x905   :  { %1602 = vtanh.f32 %v474_v19 }
 0x90b   :  { %v1603_v21 = vpop.eup %1602 }
 0x90c   :  { %478 = vrot.lane.b32.xlu2 %v1603_v21, %s1846_s23 }
 0x966   :  { %v479_v26 = vpop.permute.xlu2 %478 }
 0x967   :  { %v481_v28 = vmul.f32 %v479_v26, %v476_v22 }
 0x969   :  { %v485_v30 = vadd.f32 %v484_v27, %v481_v28 }
 0x96b   :  { %v492_v32 = vrot.slane %v485_v30, 6 }
 0x96d   :  { %493 = vrot.lane.b32.xlu0 %v492_v32, %s1846_s23 }
 0x9df   :  { %v494_v33 = vpop.permute.xlu0 %493 }
 0x9e0   :  { %1528 = vmatmul.msk.f32.vlgmr.msrb.gmra.mxu1 %vm163_vm0, %v494_v33 }
 0x9e1   :  { %1275 = vmatpush.msrb.mxu1 %v2064_v62 }
 0x9e3   :  { %1276 = vmatpush.msrb.mxu1 %v2066_v63 }
 0xa5d   :  { %v514_v34 = vpop.f32.mrf.mxu1 }
 0xa5e   :  { %v515_v35 = vadd.f32 %v1981_v24, %v514_v34  ;;  %v2121_v34 = vld [vmem:[%s2296_s5 + $0x1] ss:$0 sm:$0xff]  ;;  %s1847_s5 = smov [#allocation12]  }
 0xa5f   :  { %s1492_s27 = sshll.u32 %s1847_s5, 4  ;;  %s1493_s27 = int_to_ptr.vmem [resolvable:$true] %s1492_s27 }
 0xa60   :  { %538 = vrot.lane.b32.xlu1 %v515_v35, %s1845_s18  ;;  %v517_v37 = vadd.f32 %v515_v35, %v2047_v36 }
 0xa62   :  { %v1529_v38 = vmul.f32 -1.442695, %v517_v37 }
 0xa64   :  { %1604 = vpow2.f32 %v1529_v38 }
 0xa6a   :  { %v1605_v39 = vpop.eup %1604 }
 0xa6b   :  { %v521_v40 = vadd.f32 1.0, %v1605_v39 }
 0xa6d   :  { %1606 = vrcp.f32 %v521_v40  ;;  %v533_v46 = vand.u32 2147483648, %v521_v40  ;;  %vm527_vm9 = vweird.f32 %v521_v40  ;;  %v531_v47 = vand.u32 2147483647, %v521_v40 }
 0xa6f   :  { %v534_v29 = vor.u32 1.1754944e-38, %v533_v46  ;;  %vm532_vm11 = vcmp.eq.f32.partialorder %v531_v47, 8.507059e+37 }
 0xa73   :  { %v1607_v41 = vpop.eup %1606 }
 0xa74   :  { %v523_v42 = vmul.f32 %v1607_v41, %v521_v40  ;;  %vm528_vm8 = vweird.f32 %v1607_v41 }
 0xa75   :  { %vm529_vm10 = vmor %vm527_vm9, %vm528_vm8 }
 0xa76   :  { %v524_v43 = vsub.f32 1.0, %v523_v42 }
 0xa78   :  { %v525_v44 = vmul.f32 %v1607_v41, %v524_v43 }
 0xa7a   :  { %v526_v45 = vadd.f32 %v1607_v41, %v525_v44 }
 0xa7c   :  { %v530_v48 = vsel %vm529_vm10, %v1607_v41, %v526_v45 }
 0xa7d   :  { %v535_v50 = vsel %vm532_vm11, %v534_v29, %v530_v48 }
 0xa7e   :  { %v548_v57 = vsub.f32 1.0, %v535_v50  ;;  %v555_v59 = vmul.f32 %v535_v50, %v492_v32 }
 0xad2   :  { %v539_v49 = vpop.permute.xlu1 %538 }
 0xad3   :  { %v541_v51 = vmul.f32 %v539_v49, %v535_v50 }
 0xad5   :  { %543 = vrot.lane.b32.xlu2 %v541_v51, %s1845_s18 }
 0xadd   :  { %339 = vrot.lane.b32.xlu2 %v2011_v23, %s1846_s23 }
 0xb2f   :  { %v544_v52 = vpop.permute.xlu2 %543 }
 0xb30   :  { %v546_v53 = vadd.f32 %v544_v52, %v2047_v36 }
 0xb32   :  { %1608 = vtanh.f32 %v546_v53 }
 0xb37   :  { %v340_v54 = vpop.permute.xlu2 %339 }
 0xb38   :  { %v1609_v55 = vpop.eup %1608  ;;  %343 = vst.msk [vmem:[#allocation2] sm:$0xc] %vm342_vm12, %v340_v54 }
 0xb39   :  { %550 = vrot.lane.b32.xlu0 %v1609_v55, %s1846_s23 }
 0xb41   :  { %413 = vrot.lane.b32.xlu0 %v2023_v56, %s1846_s23  ;;  %v2070_v56 = vld [vmem:[#allocation8 + $0x28] sm:$0xff] }
 0xb42   :  { %849 = vmatpush.msrb.mxu2 %v2070_v56  ;;  %918 = vmatpush.msrb.mxu3 %v2070_v56 }
 0xb43   :  { %991 = vmatpush.msra.mxu0 %v2070_v56  ;;  %1277 = vmatpush.msrb.mxu1 %v2070_v56 }
 0xb44   :  { %850 = vmatpush.msrb.mxu2 %v2075_v0  ;;  %919 = vmatpush.msrb.mxu3 %v2075_v0 }
 0xb45   :  { %992 = vmatpush.msra.mxu0 %v2075_v0  ;;  %1278 = vmatpush.msrb.mxu1 %v2075_v0 }
 0xbab   :  { %v551_v58 = vpop.permute.xlu0 %550 }
 0xbac   :  { %v553_v60 = vmul.f32 %v551_v58, %v548_v57 }
 0xbae   :  { %v2058_v61 = vadd.f32 %v555_v59, %v553_v60 }
 0xbb0   :  { %558 = vrot.lane.b32.xlu1 %v2058_v61, %s1846_s23  ;;  %v623_v18 = vrot.slane %v2058_v61, 6 }
 0xbb3   :  { %v414_v23 = vpop.permute.xlu0 %413 }
 0xbb4   :  { %417 = vst.msk [vmem:[#allocation2] sm:$0x30] %vm416_vm13, %v414_v23 }
 0xbb8   :  { %487 = vrot.lane.b32.xlu1 %v485_v30, %s1846_s23 }
 0xc22   :  { %v559_v5 = vpop.permute.xlu1 %558 }
 0xc23   :  { %561 = vst.msk [vmem:[#allocation2 + $0x8] sm:$0x3] %vm271_vm7, %v559_v5  ;;  %1530 = vmatmul.msk.f32.vlgmr.msra.gmra.mxu2 %vm163_vm0, %v559_v5 }
 0xc24   :  { %1062 = vmatpush.msra.mxu2 %v2064_v62 }
 0xc26   :  { %1063 = vmatpush.msra.mxu2 %v2066_v63 }
 0xc28   :  { %1064 = vmatpush.msra.mxu2 %v2070_v56 }
 0xc2a   :  { %v488_v7 = vpop.permute.xlu1 %487  ;;  %1065 = vmatpush.msra.mxu2 %v2075_v0 }
 0xc2b   :  { %491 = vst.msk [vmem:[#allocation2] sm:$0xc0] %vm490_vm14, %v488_v7  ;;  %1541 = vmatmul.msk.f32.vlgmr.msrb.gmra.mxu2 %vm163_vm0, %v2095_v6 }
 0xc2c   :  { %1348 = vmatpush.msrb.mxu2 %v2064_v62 }
 0xc2e   :  { %1349 = vmatpush.msrb.mxu2 %v2066_v63 }
 0xc30   :  { %1350 = vmatpush.msrb.mxu2 %v2070_v56 }
 0xc32   :  { %v779_v8 = vld [vmem:[#allocation2] sm:$0xff]  ;;  %1351 = vmatpush.msrb.mxu2 %v2075_v0 }
 0xc33   :  { %1537 = vmatmul.msk.f32.vlgmr.msra.gmra.mxu1 %vm163_vm0, %v779_v8 }
 0xca6   :  { %v581_v9 = vpop.f32.mrf.mxu2 }
 0xca7   :  { %v582_v10 = vadd.f32 %v1981_v24, %v581_v9 }
 0xca9   :  { %v585_v11 = vrot.slane %v582_v10, 6 }
 0xcab   :  { %v587_v12 = vadd.f32 %v585_v11, %v2047_v36  ;;  %607 = vrot.lane.b32.xlu2 %v585_v11, %s1845_s18 }
 0xcad   :  { %v1531_v14 = vmul.f32 -1.442695, %v587_v12 }
 0xcae   :  { %v852_v15 = vpop.f32.mrf.mxu2 }
 0xcaf   :  { %1610 = vpow2.f32 %v1531_v14  ;;  %v853_v16 = vadd.f32 %v2113_v13, %v852_v15 }
 0xcb0   :  { %v814_v35 = vpop.f32.mrf.mxu1 }
 0xcb1   :  { %876 = vrot.lane.b32.xlu0 %v853_v16, %s1845_s18  ;;  %v2124_v37 = vadd.f32 %v2121_v34, %v814_v35 }
 0xcb3   :  { %v855_v38 = vadd.f32 %v853_v16, %v2124_v37 }
 0xcb5   :  { %v1611_v17 = vpop.eup %1610  ;;  %v1542_v39 = vmul.f32 -1.442695, %v855_v38 }
 0xcb6   :  { %v591_v19 = vadd.f32 1.0, %v1611_v17 }
 0xcb8   :  { %1612 = vrcp.f32 %v591_v19  ;;  %v603_v26 = vand.u32 2147483648, %v591_v19  ;;  %v601_v28 = vand.u32 2147483647, %v591_v19  ;;  %vm597_vm2 = vweird.f32 %v591_v19 }
 0xcb9   :  { %1614 = vpow2.f32 %v1542_v39 }
 0xcba   :  { %v604_v32 = vor.u32 1.1754944e-38, %v603_v26  ;;  %vm602_vm4 = vcmp.eq.f32.partialorder %v601_v28, 8.507059e+37 }
 0xcbe   :  { %v1613_v21 = vpop.eup %1612 }
 0xcbf   :  { %v593_v22 = vmul.f32 %v1613_v21, %v591_v19  ;;  %vm598_vm15 = vweird.f32 %v1613_v21  ;;  %v1615_v40 = vpop.eup %1614 }
 0xcc0   :  { %vm599_vm3 = vmor %vm597_vm2, %vm598_vm15  ;;  %v859_v41 = vadd.f32 1.0, %v1615_v40 }
 0xcc1   :  { %v594_v25 = vsub.f32 1.0, %v593_v22 }
 0xcc2   :  { %1616 = vrcp.f32 %v859_v41  ;;  %v871_v29 = vand.u32 2147483648, %v859_v41  ;;  %vm865_vm6 = vweird.f32 %v859_v41  ;;  %v869_v49 = vand.u32 2147483647, %v859_v41 }
 0xcc3   :  { %v595_v27 = vmul.f32 %v1613_v21, %v594_v25 }
 0xcc4   :  { %v872_v51 = vor.u32 1.1754944e-38, %v871_v29  ;;  %vm870_vm9 = vcmp.eq.f32.partialorder %v869_v49, 8.507059e+37 }
 0xcc5   :  { %v596_v30 = vadd.f32 %v1613_v21, %v595_v27 }
 0xcc7   :  { %v600_v20 = vsel %vm599_vm3, %v1613_v21, %v596_v30 }
 0xcc8   :  { %v605_v33 = vsel %vm602_vm4, %v604_v32, %v600_v20  ;;  %v1617_v44 = vpop.eup %1616 }
 0xcc9   :  { %v625_v31 = vmul.f32 %v623_v18, %v605_v33  ;;  %v861_v45 = vmul.f32 %v1617_v44, %v859_v41  ;;  %vm866_vm5 = vweird.f32 %v1617_v44  ;;  %v617_v23 = vsub.f32 1.0, %v605_v33 }
 0xcca   :  { %vm867_vm8 = vmor %vm865_vm6, %vm866_vm5 }
 0xccb   :  { %v862_v46 = vsub.f32 1.0, %v861_v45 }
 0xccd   :  { %v863_v47 = vmul.f32 %v1617_v44, %v862_v46 }
 0xccf   :  { %v864_v48 = vadd.f32 %v1617_v44, %v863_v47 }
 0xcd1   :  { %v868_v50 = vsel %vm867_vm8, %v1617_v44, %v864_v48 }
 0xcd2   :  { %v873_v53 = vsel %vm870_vm9, %v872_v51, %v868_v50 }
 0xcd3   :  { %v886_v5 = vsub.f32 1.0, %v873_v53 }
 0xd05   :  { %v608_v42 = vpop.permute.xlu2 %607 }
 0xd06   :  { %v610_v43 = vmul.f32 %v608_v42, %v605_v33 }
 0xd08   :  { %612 = vrot.lane.b32.xlu1 %v610_v43, %s1845_s18 }
 0xd23   :  { %v877_v52 = vpop.permute.xlu0 %876 }
 0xd24   :  { %v879_v54 = vmul.f32 %v877_v52, %v873_v53 }
 0xd26   :  { %881 = vrot.lane.b32.xlu2 %v879_v54, %s1845_s18 }
 0xd2e   :  { %892 = vrot.lane.b32.xlu2 %v2095_v6, %s1844_s15 }
 0xd7a   :  { %v613_v55 = vpop.permute.xlu1 %612 }
 0xd7b   :  { %v615_v57 = vadd.f32 %v613_v55, %v2047_v36 }
 0xd7d   :  { %1618 = vtanh.f32 %v615_v57 }
 0xd80   :  { %v882_v58 = vpop.permute.xlu2 %881 }
 0xd81   :  { %v884_v59 = vadd.f32 %v882_v58, %v2124_v37 }
 0xd83   :  { %v1619_v60 = vpop.eup %1618  ;;  %1620 = vtanh.f32 %v884_v59 }
 0xd84   :  { %619 = vrot.lane.b32.xlu0 %v1619_v60, %s1846_s23 }
 0xd88   :  { %v893_v4 = vpop.permute.xlu2 %892 }
 0xd89   :  { %v1621_v61 = vpop.eup %1620  ;;  %v895_v8 = vmul.f32 %v893_v4, %v873_v53 }
 0xd8a   :  { %888 = vrot.lane.b32.xlu1 %v1621_v61, %s1846_s23 }
 0xdf6   :  { %v620_v1 = vpop.permute.xlu0 %619 }
 0xdf7   :  { %v622_v2 = vmul.f32 %v620_v1, %v617_v23 }
 0xdf9   :  { %v2135_v3 = vadd.f32 %v625_v31, %v622_v2 }
 0xdfb   :  { %v632_v6 = vrot.slane %v2135_v3, 2  ;;  %v696_v4 = vrot.slane %v2135_v3, 6 }
 0xdfc   :  { %v889_v7 = vpop.permute.xlu1 %888 }
 0xdfd   :  { %v891_v9 = vmul.f32 %v889_v7, %v886_v5  ;;  %633 = vrot.lane.b32.xlu0 %v632_v6, %s1846_s23 }
 0xdff   :  { %v2139_v10 = vadd.f32 %v895_v8, %v891_v9 }
 0xe01   :  { %898 = vrot.lane.b32.xlu1 %v2139_v10, %s1846_s23 }
 0xe6f   :  { %v634_v11 = vpop.permute.xlu0 %633 }
 0xe70   :  { %1532 = vmatmul.msk.f32.vlgmr.msra.gmra.mxu3 %vm163_vm0, %v634_v11  ;;  %v963_v11 = vrot.slane %v2139_v10, 6 }
 0xe71   :  { %1135 = vmatpush.msra.mxu3 %v2064_v62 }
 0xe73   :  { %v899_v12 = vpop.permute.xlu1 %898  ;;  %1136 = vmatpush.msra.mxu3 %v2066_v63 }
 0xe74   :  { %901 = vst.msk [vmem:[#allocation2] sm:$0x3] %vm271_vm7, %v899_v12 }
 0xe75   :  { %1137 = vmatpush.msra.mxu3 %v2070_v56 }
 0xe77   :  { %1138 = vmatpush.msra.mxu3 %v2075_v0 }
 0xe78   :  { %1543 = vmatmul.msk.f32.vlgmr.msrb.gmra.mxu3 %vm163_vm0, %v899_v12 }
 0xef3   :  { %v654_v14 = vpop.f32.mrf.mxu3 }
 0xef4   :  { %v655_v15 = vadd.f32 %v1981_v24, %v654_v14 }
 0xef6   :  { %v658_v16 = vrot.slane %v655_v15, 4 }
 0xef8   :  { %680 = vrot.lane.b32.xlu2 %v658_v16, %s1845_s18  ;;  %v660_v22 = vadd.f32 %v658_v16, %v2047_v36 }
 0xefa   :  { %v1533_v25 = vmul.f32 -1.442695, %v660_v22 }
 0xefb   :  { %v921_v17 = vpop.f32.mrf.mxu3 }
 0xefc   :  { %v922_v19 = vadd.f32 %v2113_v13, %v921_v17  ;;  %1622 = vpow2.f32 %v1533_v25 }
 0xefe   :  { %v925_v21 = vrot.slane %v922_v19, 6 }
 0xf00   :  { %947 = vrot.lane.b32.xlu0 %v925_v21, %s1845_s18  ;;  %v927_v32 = vadd.f32 %v925_v21, %v2124_v37 }
 0xf02   :  { %v1623_v26 = vpop.eup %1622  ;;  %v1544_v20 = vmul.f32 -1.442695, %v927_v32 }
 0xf03   :  { %v664_v27 = vadd.f32 1.0, %v1623_v26 }
 0xf05   :  { %1624 = vrcp.f32 %v664_v27  ;;  %v676_v35 = vand.u32 2147483648, %v664_v27  ;;  %vm670_vm11 = vweird.f32 %v664_v27  ;;  %v674_v38 = vand.u32 2147483647, %v664_v27 }
 0xf06   :  { %1626 = vpow2.f32 %v1544_v20 }
 0xf07   :  { %v677_v41 = vor.u32 1.1754944e-38, %v676_v35  ;;  %vm675_vm2 = vcmp.eq.f32.partialorder %v674_v38, 8.507059e+37 }
 0xf0b   :  { %v1625_v28 = vpop.eup %1624 }
 0xf0c   :  { %v666_v30 = vmul.f32 %v1625_v28, %v664_v27  ;;  %vm671_vm10 = vweird.f32 %v1625_v28  ;;  %v1627_v39 = vpop.eup %1626 }
 0xf0d   :  { %vm672_vm15 = vmor %vm670_vm11, %vm671_vm10  ;;  %v931_v42 = vadd.f32 1.0, %v1627_v39 }
 0xf0e   :  { %v667_v18 = vsub.f32 1.0, %v666_v30 }
 0xf0f   :  { %1628 = vrcp.f32 %v931_v42  ;;  %v943_v50 = vand.u32 2147483648, %v931_v42  ;;  %vm937_vm4 = vweird.f32 %v931_v42  ;;  %v941_v51 = vand.u32 2147483647, %v931_v42 }
 0xf10   :  { %v668_v33 = vmul.f32 %v1625_v28, %v667_v18 }
 0xf11   :  { %v944_v53 = vor.u32 1.1754944e-38, %v943_v50  ;;  %vm942_vm6 = vcmp.eq.f32.partialorder %v941_v51, 8.507059e+37 }
 0xf12   :  { %v669_v31 = vadd.f32 %v1625_v28, %v668_v33 }
 0xf14   :  { %v673_v40 = vsel %vm672_vm15, %v1625_v28, %v669_v31 }
 0xf15   :  { %v678_v43 = vsel %vm675_vm2, %v677_v41, %v673_v40  ;;  %v1629_v46 = vpop.eup %1628 }
 0xf16   :  { %v933_v47 = vmul.f32 %v1629_v46, %v931_v42  ;;  %vm938_vm3 = vweird.f32 %v1629_v46  ;;  %v690_v2 = vsub.f32 1.0, %v678_v43  ;;  %v698_v6 = vmul.f32 %v696_v4, %v678_v43 }
 0xf17   :  { %vm939_vm5 = vmor %vm937_vm4, %vm938_vm3 }
 0xf18   :  { %v934_v48 = vsub.f32 1.0, %v933_v47 }
 0xf1a   :  { %v935_v29 = vmul.f32 %v1629_v46, %v934_v48 }
 0xf1c   :  { %v936_v49 = vadd.f32 %v1629_v46, %v935_v29 }
 0xf1e   :  { %v940_v52 = vsel %vm939_vm5, %v1629_v46, %v936_v49 }
 0xf1f   :  { %v945_v55 = vsel %vm942_vm6, %v944_v53, %v940_v52 }
 0xf20   :  { %v957_v12 = vsub.f32 1.0, %v945_v55  ;;  %v965_v15 = vmul.f32 %v963_v11, %v945_v55 }
 0xf52   :  { %v681_v44 = vpop.permute.xlu2 %680 }
 0xf53   :  { %v683_v45 = vmul.f32 %v681_v44, %v678_v43 }
 0xf55   :  { %685 = vrot.lane.b32.xlu1 %v683_v45, %s1845_s18 }
 0xf72   :  { %v948_v54 = vpop.permute.xlu0 %947 }
 0xf73   :  { %v950_v57 = vmul.f32 %v948_v54, %v945_v55 }
 0xf75   :  { %952 = vrot.lane.b32.xlu2 %v950_v57, %s1845_s18 }
 0xfc7   :  { %v686_v58 = vpop.permute.xlu1 %685 }
 0xfc8   :  { %v688_v59 = vadd.f32 %v686_v58, %v2047_v36 }
 0xfca   :  { %1630 = vtanh.f32 %v688_v59 }
 0xfcf   :  { %v953_v60 = vpop.permute.xlu2 %952 }
 0xfd0   :  { %v1631_v61 = vpop.eup %1630  ;;  %v955_v23 = vadd.f32 %v953_v60, %v2124_v37 }
 0xfd1   :  { %692 = vrot.lane.b32.xlu0 %v1631_v61, %s1846_s23 }
 0xfd2   :  { %1632 = vtanh.f32 %v955_v23 }
 0xfd8   :  { %v1633_v1 = vpop.eup %1632 }
 0xfd9   :  { %959 = vrot.lane.b32.xlu1 %v1633_v1, %s1846_s23 }
0x1043   :  { %v693_v5 = vpop.permute.xlu0 %692 }
0x1044   :  { %v695_v7 = vmul.f32 %v693_v5, %v690_v2 }
0x1046   :  { %v2163_v8 = vadd.f32 %v698_v6, %v695_v7 }
0x1048   :  { %v705_v9 = vrot.slane %v2163_v8, 4 }
0x104a   :  { %706 = vrot.lane.b32.xlu2 %v705_v9, %s1846_s23 }
0x104b   :  { %v960_v14 = vpop.permute.xlu1 %959 }
0x104c   :  { %v962_v16 = vmul.f32 %v960_v14, %v957_v12 }
0x104e   :  { %v2168_v17 = vadd.f32 %v965_v15, %v962_v16 }
0x1050   :  { %v972_v19 = vrot.slane %v2168_v17, 2  ;;  %v1036_v48 = vrot.slane %v2168_v17, 6 }
0x1052   :  { %973 = vrot.lane.b32.xlu0 %v972_v19, %s1846_s23 }
0x10a4   :  { %v707_v21 = vpop.permute.xlu2 %706 }
0x10a5   :  { %1534 = vmatmul.msk.f32.vlgmr.msrb.gmra.mxu0 %vm163_vm0, %v707_v21 }
0x10a6   :  { %1202 = vmatpush.msrb.mxu0 %v2064_v62 }
0x10a8   :  { %1203 = vmatpush.msrb.mxu0 %v2066_v63 }
0x10aa   :  { %1204 = vmatpush.msrb.mxu0 %v2070_v56 }
0x10ac   :  { %1205 = vmatpush.msrb.mxu0 %v2075_v0 }
0x10c4   :  { %v974_v10 = vpop.permute.xlu0 %973 }
0x10c5   :  { %1545 = vmatmul.msk.f32.vlgmr.msra.gmra.mxu0 %vm163_vm0, %v974_v10 }
0x1122   :  { %v727_v22 = vpop.f32.mrf.mxu0 }
0x1123   :  { %v728_v45 = vadd.f32 %v1981_v24, %v727_v22 }
0x1125   :  { %v731_v46 = vrot.slane %v728_v45, 2 }
0x1127   :  { %v733_v24 = vadd.f32 %v731_v46, %v2047_v36 }
0x1129   :  { %v1535_v54 = vmul.f32 -1.442695, %v733_v24 }
0x1142   :  { %v994_v25 = vpop.f32.mrf.mxu0 }
0x1143   :  { %v995_v26 = vadd.f32 %v2113_v13, %v994_v25 }
0x1145   :  { %v998_v27 = vrot.slane %v995_v26, 4 }
0x1147   :  { %1020 = vrot.lane.b32.xlu1 %v998_v27, %s1845_s18  ;;  %v1000_v28 = vadd.f32 %v998_v27, %v2124_v37 }
0x1149   :  { %v1546_v30 = vmul.f32 -1.442695, %v1000_v28 }
0x114b   :  { %1634 = vpow2.f32 %v1546_v30 }
0x1151   :  { %v1635_v62 = vpop.eup %1634 }
0x1152   :  { %v1004_v63 = vadd.f32 1.0, %v1635_v62 }
0x1154   :  { %1636 = vrcp.f32 %v1004_v63  ;;  %v1016_v33 = vand.u32 2147483648, %v1004_v63  ;;  %vm1010_vm9 = vweird.f32 %v1004_v63  ;;  %v1014_v31 = vand.u32 2147483647, %v1004_v63 }
0x1156   :  { %v1017_v38 = vor.u32 1.1754944e-38, %v1016_v33  ;;  %vm1015_vm11 = vcmp.eq.f32.partialorder %v1014_v31, 8.507059e+37 }
0x115a   :  { %v1637_v56 = vpop.eup %1636 }
0x115b   :  { %v1006_v32 = vmul.f32 %v1637_v56, %v1004_v63  ;;  %vm1011_vm8 = vweird.f32 %v1637_v56 }
0x115c   :  { %vm1012_vm10 = vmor %vm1010_vm9, %vm1011_vm8 }
0x115d   :  { %v1007_v0 = vsub.f32 1.0, %v1006_v32 }
0x115f   :  { %v1008_v18 = vmul.f32 %v1637_v56, %v1007_v0 }
0x1161   :  { %v1009_v20 = vadd.f32 %v1637_v56, %v1008_v18 }
0x1163   :  { %v1013_v35 = vsel %vm1012_vm10, %v1637_v56, %v1009_v20 }
0x1164   :  { %v1018_v40 = vsel %vm1015_vm11, %v1017_v38, %v1013_v35 }
0x1165   :  { %v1030_v47 = vsub.f32 1.0, %v1018_v40  ;;  %v1038_v49 = vmul.f32 %v1036_v48, %v1018_v40  ;;  %v769_v48 = vrot.slane %v2163_v8, 6 }
0x11b9   :  { %v1021_v39 = vpop.permute.xlu1 %1020 }
0x11ba   :  { %v1023_v41 = vmul.f32 %v1021_v39, %v1018_v40 }
0x11bc   :  { %1025 = vrot.lane.b32.xlu2 %v1023_v41, %s1845_s18 }
0x1216   :  { %v1026_v42 = vpop.permute.xlu2 %1025 }
0x1217   :  { %v1028_v43 = vadd.f32 %v1026_v42, %v2124_v37 }
0x1219   :  { %1638 = vtanh.f32 %v1028_v43 }
0x121a   :  { %1640 = vpow2.f32 %v1535_v54 }
0x121f   :  { %v1639_v44 = vpop.eup %1638 }
0x1220   :  { %1032 = vrot.lane.b32.xlu0 %v1639_v44, %s1846_s23  ;;  %v1641_v55 = vpop.eup %1640 }
0x1221   :  { %v737_v57 = vadd.f32 1.0, %v1641_v55 }
0x1223   :  { %1642 = vrcp.f32 %v737_v57  ;;  %v749_v5 = vand.u32 2147483648, %v737_v57  ;;  %vm743_vm2 = vweird.f32 %v737_v57  ;;  %v747_v6 = vand.u32 2147483647, %v737_v57 }
0x1225   :  { %v750_v11 = vor.u32 1.1754944e-38, %v749_v5  ;;  %vm748_vm4 = vcmp.eq.f32.partialorder %v747_v6, 8.507059e+37 }
0x1228   :  { %753 = vrot.lane.b32.xlu0 %v731_v46, %s1845_s18 }
0x1229   :  { %v1643_v58 = vpop.eup %1642 }
0x122a   :  { %v739_v59 = vmul.f32 %v1643_v58, %v737_v57  ;;  %vm744_vm15 = vweird.f32 %v1643_v58 }
0x122b   :  { %vm745_vm3 = vmor %vm743_vm2, %vm744_vm15 }
0x122c   :  { %v740_v60 = vsub.f32 1.0, %v739_v59 }
0x122e   :  { %v741_v61 = vmul.f32 %v1643_v58, %v740_v60 }
0x1230   :  { %v742_v2 = vadd.f32 %v1643_v58, %v741_v61 }
0x1232   :  { %v746_v7 = vsel %vm745_vm3, %v1643_v58, %v742_v2 }
0x1233   :  { %v751_v12 = vsel %vm748_vm4, %v750_v11, %v746_v7 }
0x1234   :  { %v763_v46 = vsub.f32 1.0, %v751_v12 }
0x1292   :  { %v1033_v29 = vpop.permute.xlu0 %1032 }
0x1293   :  { %v1035_v50 = vmul.f32 %v1033_v29, %v1030_v47  ;;  %v771_v29 = vmul.f32 %v769_v48, %v751_v12 }
0x1295   :  { %v2187_v51 = vadd.f32 %v1038_v49, %v1035_v50 }
0x1297   :  { %v1045_v52 = vrot.slane %v2187_v51, 4  ;;  %v1109_v41 = vrot.slane %v2187_v51, 6 }
0x1299   :  { %1046 = vrot.lane.b32.xlu1 %v1045_v52, %s1846_s23 }
0x129a   :  { %v754_v9 = vpop.permute.xlu0 %753 }
0x129b   :  { %v756_v14 = vmul.f32 %v754_v9, %v751_v12 }
0x130b   :  { %v1047_v53 = vpop.permute.xlu1 %1046 }
0x130c   :  { %1547 = vmatmul.msk.f32.vlgmr.msra.gmra.mxu2 %vm163_vm0, %v1047_v53 }
0x138f   :  { %v1067_v23 = vpop.f32.mrf.mxu2 }
0x1390   :  { %v1068_v1 = vadd.f32 %v2113_v13, %v1067_v23 }
0x1392   :  { %v1071_v4 = vrot.slane %v1068_v1, 2 }
0x1394   :  { %1093 = vrot.lane.b32.xlu2 %v1071_v4, %s1845_s18  ;;  %v1073_v15 = vadd.f32 %v1071_v4, %v2124_v37 }
0x1396   :  { %v1548_v16 = vmul.f32 -1.442695, %v1073_v15 }
0x1398   :  { %1644 = vpow2.f32 %v1548_v16 }
0x139c   :  { %758 = vrot.lane.b32.xlu2 %v756_v14, %s1845_s18 }
0x139e   :  { %v1645_v19 = vpop.eup %1644 }
0x139f   :  { %v1077_v21 = vadd.f32 1.0, %v1645_v19 }
0x13a1   :  { %1646 = vrcp.f32 %v1077_v21  ;;  %v1089_v28 = vand.u32 2147483648, %v1077_v21  ;;  %vm1083_vm6 = vweird.f32 %v1077_v21  ;;  %v1087_v30 = vand.u32 2147483647, %v1077_v21 }
0x13a3   :  { %v1090_v63 = vor.u32 1.1754944e-38, %v1089_v28  ;;  %vm1088_vm9 = vcmp.eq.f32.partialorder %v1087_v30, 8.507059e+37 }
0x13a7   :  { %v1647_v10 = vpop.eup %1646 }
0x13a8   :  { %v1079_v22 = vmul.f32 %v1647_v10, %v1077_v21  ;;  %vm1084_vm5 = vweird.f32 %v1647_v10 }
0x13a9   :  { %vm1085_vm8 = vmor %vm1083_vm6, %vm1084_vm5 }
0x13aa   :  { %v1080_v25 = vsub.f32 1.0, %v1079_v22 }
0x13ac   :  { %v1081_v26 = vmul.f32 %v1647_v10, %v1080_v25 }
0x13ae   :  { %v1082_v27 = vadd.f32 %v1647_v10, %v1081_v26 }
0x13b0   :  { %v1086_v62 = vsel %vm1085_vm8, %v1647_v10, %v1082_v27 }
0x13b1   :  { %v1091_v32 = vsel %vm1088_vm9, %v1090_v63, %v1086_v62 }
0x13b2   :  { %v1111_v43 = vmul.f32 %v1109_v41, %v1091_v32 }
0x13ee   :  { %v1094_v56 = vpop.permute.xlu2 %1093 }
0x13ef   :  { %v1096_v0 = vmul.f32 %v1094_v56, %v1091_v32 }
0x13f1   :  { %1098 = vrot.lane.b32.xlu1 %v1096_v0, %s1845_s18 }
0x13f6   :  { %v759_v18 = vpop.permute.xlu2 %758 }
0x13f7   :  { %v761_v20 = vadd.f32 %v759_v18, %v2047_v36  ;;  %v1103_v36 = vsub.f32 1.0, %v1091_v32 }
0x13f9   :  { %1648 = vtanh.f32 %v761_v20 }
0x13ff   :  { %v1649_v33 = vpop.eup %1648 }
0x1400   :  { %765 = vrot.lane.b32.xlu1 %v1649_v33, %s1846_s23 }
0x1408   :  { %701 = vrot.lane.b32.xlu1 %v2163_v8, %s1846_s23 }
0x1463   :  { %v1099_v31 = vpop.permute.xlu1 %1098 }
0x1464   :  { %v1101_v35 = vadd.f32 %v1099_v31, %v2124_v37 }
0x1466   :  { %1650 = vtanh.f32 %v1101_v35 }
0x146c   :  { %v1651_v38 = vpop.eup %1650 }
0x146d   :  { %1105 = vrot.lane.b32.xlu0 %v1651_v38, %s1846_s23 }
0x1472   :  { %v766_v39 = vpop.permute.xlu1 %765 }
0x1475   :  { %628 = vrot.lane.b32.xlu0 %v2135_v3, %s1846_s23  ;;  %v768_v3 = vmul.f32 %v766_v39, %v763_v46 }
0x1477   :  { %v772_v49 = vadd.f32 %v771_v29, %v768_v3 }
0x147a   :  { %v702_v40 = vpop.permute.xlu1 %701 }
0x147b   :  { %704 = vst.msk [vmem:[#allocation2 + $0x8] sm:$0x30] %vm416_vm13, %v702_v40 }
0x14df   :  { %v1106_v42 = vpop.permute.xlu0 %1105 }
0x14e0   :  { %v1108_v44 = vmul.f32 %v1106_v42, %v1103_v36 }
0x14e2   :  { %v2208_v45 = vadd.f32 %v1111_v43, %v1108_v44 }
0x14e4   :  { %v1118_v37 = vrot.slane %v2208_v45, 6 }
0x14e6   :  { %1119 = vrot.lane.b32.xlu2 %v1118_v37, %s1846_s23 }
0x14e7   :  { %v629_v47 = vpop.permute.xlu0 %628 }
0x14e8   :  { %631 = vst.msk [vmem:[#allocation2 + $0x8] sm:$0xc] %vm342_vm12, %v629_v47 }
0x14ee   :  { %774 = vrot.lane.b32.xlu2 %v772_v49, %s1846_s23 }
0x1540   :  { %v1120_v50 = vpop.permute.xlu2 %1119 }
0x1541   :  { %1549 = vmatmul.msk.f32.vlgmr.msra.gmra.mxu3 %vm163_vm0, %v1120_v50 }
0x1548   :  { %v775_v52 = vpop.permute.xlu2 %774 }
0x1549   :  { %777 = vst.msk [vmem:[#allocation2 + $0x8] sm:$0xc0] %vm490_vm14, %v775_v52 }
0x154a   :  { %778 = vst.msk [vmem:[#allocation12 - $0x6] sm:$0xc0] %vm490_vm14, %v775_v52 }
0x1550   :  { %v780_v53 = vld [vmem:[#allocation2 + $0x8] sm:$0xff] }
0x1551   :  { %1538 = vmatmul.msk.f32.gmra.mxu1 %vm163_vm0, %v780_v53 }
0x15c4   :  { %v1140_v24 = vpop.f32.mrf.mxu3 }
0x15c5   :  { %v1141_v8 = vadd.f32 %v2113_v13, %v1140_v24 }
0x15c7   :  { %1164 = vrot.lane.b32.xlu0 %v1141_v8, %s1845_s18 }
0x15ce   :  { %v817_v54 = vpop.f32.mrf.mxu1 }
0x15cf   :  { %v2222_v55 = vadd.f32 %v2121_v34, %v817_v54 }
0x15d1   :  { %v1143_v57 = vadd.f32 %v1141_v8, %v2222_v55 }
0x15d3   :  { %v1550_v58 = vmul.f32 -1.442695, %v1143_v57 }
0x15d5   :  { %1652 = vpow2.f32 %v1550_v58 }
0x15db   :  { %v1653_v59 = vpop.eup %1652 }
0x15dc   :  { %v1147_v60 = vadd.f32 1.0, %v1653_v59 }
0x15de   :  { %1654 = vrcp.f32 %v1147_v60  ;;  %v1159_v5 = vand.u32 2147483648, %v1147_v60  ;;  %vm1153_vm11 = vweird.f32 %v1147_v60  ;;  %v1157_v6 = vand.u32 2147483647, %v1147_v60 }
0x15e0   :  { %v1160_v34 = vor.u32 1.1754944e-38, %v1159_v5  ;;  %vm1158_vm2 = vcmp.eq.f32.partialorder %v1157_v6, 8.507059e+37 }
0x15e4   :  { %v1655_v61 = vpop.eup %1654 }
0x15e5   :  { %v1149_v23 = vmul.f32 %v1655_v61, %v1147_v60  ;;  %vm1154_vm10 = vweird.f32 %v1655_v61 }
0x15e6   :  { %vm1155_vm15 = vmor %vm1153_vm11, %vm1154_vm10 }
0x15e7   :  { %v1150_v1 = vsub.f32 1.0, %v1149_v23 }
0x15e9   :  { %v1151_v2 = vmul.f32 %v1655_v61, %v1150_v1 }
0x15eb   :  { %v1152_v4 = vadd.f32 %v1655_v61, %v1151_v2 }
0x15ed   :  { %v1156_v7 = vsel %vm1155_vm15, %v1655_v61, %v1152_v4 }
0x15ee   :  { %v1161_v11 = vsel %vm1158_vm2, %v1160_v34, %v1156_v7 }
0x15ef   :  { %v1174_v19 = vsub.f32 1.0, %v1161_v11  ;;  %v1181_v10 = vmul.f32 %v1161_v11, %v1118_v37 }
0x1639   :  { %v1165_v9 = vpop.permute.xlu0 %1164 }
0x163a   :  { %v1167_v12 = vmul.f32 %v1165_v9, %v1161_v11 }
0x163c   :  { %1169 = vrot.lane.b32.xlu1 %v1167_v12, %s1845_s18 }
0x16ae   :  { %v1170_v14 = vpop.permute.xlu1 %1169 }
0x16af   :  { %v1172_v15 = vadd.f32 %v1170_v14, %v2222_v55 }
0x16b1   :  { %1656 = vtanh.f32 %v1172_v15 }
0x16b7   :  { %v1657_v16 = vpop.eup %1656 }
0x16b8   :  { %1176 = vrot.lane.b32.xlu2 %v1657_v16, %s1846_s23 }
0x1712   :  { %v1177_v21 = vpop.permute.xlu2 %1176 }
0x1713   :  { %v1179_v22 = vmul.f32 %v1177_v21, %v1174_v19 }
0x1715   :  { %v1182_v25 = vadd.f32 %v1181_v10, %v1179_v22 }
0x1717   :  { %1184 = vrot.lane.b32.xlu0 %v1182_v25, %s1846_s23  ;;  %v1249_v46 = vrot.slane %v1182_v25, 6 }
0x1789   :  { %v1185_v26 = vpop.permute.xlu0 %1184 }
0x178a   :  { %1187 = vst.msk [vmem:[#allocation2 + $0x8] sm:$0x3] %vm271_vm7, %v1185_v26  ;;  %1551 = vmatmul.msk.f32.vlgmr.msrb.gmra.mxu0 %vm163_vm0, %v1185_v26 }
0x1807   :  { %v1207_v27 = vpop.f32.mrf.mxu0 }
0x1808   :  { %v1208_v28 = vadd.f32 %v2113_v13, %v1207_v27 }
0x180a   :  { %v1211_v30 = vrot.slane %v1208_v28, 6 }
0x180c   :  { %1233 = vrot.lane.b32.xlu1 %v1211_v30, %s1845_s18  ;;  %v1213_v62 = vadd.f32 %v1211_v30, %v2222_v55 }
0x180e   :  { %v1552_v63 = vmul.f32 -1.442695, %v1213_v62 }
0x1810   :  { %1658 = vpow2.f32 %v1552_v63 }
0x1816   :  { %v1659_v56 = vpop.eup %1658 }
0x1817   :  { %v1217_v32 = vadd.f32 1.0, %v1659_v56 }
0x1819   :  { %1660 = vrcp.f32 %v1217_v32  ;;  %v1229_v35 = vand.u32 2147483648, %v1217_v32  ;;  %vm1223_vm3 = vweird.f32 %v1217_v32  ;;  %v1227_v38 = vand.u32 2147483647, %v1217_v32 }
0x181b   :  { %v1230_v40 = vor.u32 1.1754944e-38, %v1229_v35  ;;  %vm1228_vm5 = vcmp.eq.f32.partialorder %v1227_v38, 8.507059e+37 }
0x181f   :  { %v1661_v0 = vpop.eup %1660 }
0x1820   :  { %v1219_v18 = vmul.f32 %v1661_v0, %v1217_v32  ;;  %vm1224_vm7 = vweird.f32 %v1661_v0 }
0x1821   :  { %vm1225_vm4 = vmor %vm1223_vm3, %vm1224_vm7 }
0x1822   :  { %v1220_v20 = vsub.f32 1.0, %v1219_v18 }
0x1824   :  { %v1221_v33 = vmul.f32 %v1661_v0, %v1220_v20 }
0x1826   :  { %v1222_v31 = vadd.f32 %v1661_v0, %v1221_v33 }
0x1828   :  { %v1226_v39 = vsel %vm1225_vm4, %v1661_v0, %v1222_v31 }
0x1829   :  { %v1231_v41 = vsel %vm1228_vm5, %v1230_v40, %v1226_v39 }
0x182a   :  { %v1243_v47 = vsub.f32 1.0, %v1231_v41  ;;  %v1251_v29 = vmul.f32 %v1249_v46, %v1231_v41 }
0x187e   :  { %v1234_v36 = vpop.permute.xlu1 %1233 }
0x187f   :  { %v1236_v42 = vmul.f32 %v1234_v36, %v1231_v41 }
0x1881   :  { %1238 = vrot.lane.b32.xlu2 %v1236_v42, %s1845_s18 }
0x18db   :  { %v1239_v43 = vpop.permute.xlu2 %1238 }
0x18dc   :  { %v1241_v44 = vadd.f32 %v1239_v43, %v2222_v55 }
0x18de   :  { %1662 = vtanh.f32 %v1241_v44 }
0x18e4   :  { %v1663_v37 = vpop.eup %1662 }
0x18e5   :  { %1245 = vrot.lane.b32.xlu0 %v1663_v37, %s1846_s23 }
0x1957   :  { %v1246_v48 = vpop.permute.xlu0 %1245 }
0x1958   :  { %v1248_v3 = vmul.f32 %v1246_v48, %v1243_v47 }
0x195a   :  { %v1252_v49 = vadd.f32 %v1251_v29, %v1248_v3  ;;  %v1410_v3 = vld [vmem:[#allocation9 + $0x10] sm:$0xff]  ;;  %v1409_v29 = vld [vmem:[#allocation9 + $0x8] sm:$0xff] }
0x195c   :  { %v1258_v50 = vrot.slane %v1252_v49, 2  ;;  %v1322_v19 = vrot.slane %v1252_v49, 6 }
0x195e   :  { %1259 = vrot.lane.b32.xlu1 %v1258_v50, %s1846_s23 }
0x19d0   :  { %v1260_v52 = vpop.permute.xlu1 %1259 }
0x19d1   :  { %1553 = vmatmul.msk.f32.vlgmr.msrb.gmra.mxu1 %vm163_vm0, %v1260_v52 }
0x1a4e   :  { %v1280_v53 = vpop.f32.mrf.mxu1 }
0x1a4f   :  { %v1281_v24 = vadd.f32 %v2113_v13, %v1280_v53 }
0x1a51   :  { %v1284_v8 = vrot.slane %v1281_v24, 4 }
0x1a53   :  { %1306 = vrot.lane.b32.xlu2 %v1284_v8, %s1845_s18  ;;  %v1286_v54 = vadd.f32 %v1284_v8, %v2222_v55 }
0x1a55   :  { %v1554_v57 = vmul.f32 -1.442695, %v1286_v54 }
0x1a57   :  { %1664 = vpow2.f32 %v1554_v57 }
0x1a5d   :  { %v1665_v58 = vpop.eup %1664 }
0x1a5e   :  { %v1290_v59 = vadd.f32 1.0, %v1665_v58 }
0x1a60   :  { %1666 = vrcp.f32 %v1290_v59  ;;  %v1302_v4 = vand.u32 2147483648, %v1290_v59  ;;  %vm1296_vm8 = vweird.f32 %v1290_v59  ;;  %v1300_v5 = vand.u32 2147483647, %v1290_v59 }
0x1a62   :  { %v1303_v7 = vor.u32 1.1754944e-38, %v1302_v4  ;;  %vm1301_vm10 = vcmp.eq.f32.partialorder %v1300_v5, 8.507059e+37 }
0x1a66   :  { %v1667_v60 = vpop.eup %1666 }
0x1a67   :  { %v1292_v61 = vmul.f32 %v1667_v60, %v1290_v59  ;;  %vm1297_vm6 = vweird.f32 %v1667_v60 }
0x1a68   :  { %vm1298_vm9 = vmor %vm1296_vm8, %vm1297_vm6 }
0x1a69   :  { %v1293_v23 = vsub.f32 1.0, %v1292_v61 }
0x1a6b   :  { %v1294_v1 = vmul.f32 %v1667_v60, %v1293_v23 }
0x1a6d   :  { %v1295_v2 = vadd.f32 %v1667_v60, %v1294_v1 }
0x1a6f   :  { %v1299_v6 = vsel %vm1298_vm9, %v1667_v60, %v1295_v2  ;;  %v1579_v60 = vld [vmem:[%s2299_s8] ss:$0 sm:$0xff]  ;;  %s1849_s8 = smov [#allocation11]  }
0x1a70   :  { %v1304_v9 = vsel %vm1301_vm10, %v1303_v7, %v1299_v6  ;;  %s1479_s10 = sshll.u32 %s1849_s8, 4  ;;  %s1480_s10 = int_to_ptr.vmem [resolvable:$true] %s1479_s10 }
0x1a71   :  { %v1316_v16 = vsub.f32 1.0, %v1304_v9  ;;  %v1324_v10 = vmul.f32 %v1322_v19, %v1304_v9 }
0x1aad   :  { %v1307_v34 = vpop.permute.xlu2 %1306 }
0x1aae   :  { %v1309_v11 = vmul.f32 %v1307_v34, %v1304_v9 }
0x1ab0   :  { %1311 = vrot.lane.b32.xlu0 %v1309_v11, %s1845_s18 }
0x1b22   :  { %v1312_v12 = vpop.permute.xlu0 %1311 }
0x1b23   :  { %v1314_v14 = vadd.f32 %v1312_v12, %v2222_v55 }
0x1b25   :  { %1668 = vtanh.f32 %v1314_v14 }
0x1b2b   :  { %v1669_v15 = vpop.eup %1668 }
0x1b2c   :  { %1318 = vrot.lane.b32.xlu1 %v1669_v15, %s1846_s23 }
0x1b9e   :  { %v1319_v21 = vpop.permute.xlu1 %1318 }
0x1b9f   :  { %v1321_v22 = vmul.f32 %v1319_v21, %v1316_v16 }
0x1ba1   :  { %v1325_v25 = vadd.f32 %v1324_v10, %v1321_v22 }
0x1ba3   :  { %v1331_v26 = vrot.slane %v1325_v25, 4  ;;  %v1395_v50 = vrot.slane %v1325_v25, 6 }
0x1ba5   :  { %1332 = vrot.lane.b32.xlu2 %v1331_v26, %s1846_s23 }
0x1bff   :  { %v1333_v27 = vpop.permute.xlu2 %1332 }
0x1c00   :  { %1555 = vmatmul.msk.f32.vlgmr.msrb.gmra.mxu2 %vm163_vm0, %v1333_v27 }
0x1c83   :  { %v1353_v28 = vpop.f32.mrf.mxu2 }
0x1c84   :  { %v1354_v30 = vadd.f32 %v2113_v13, %v1353_v28 }
0x1c86   :  { %v1357_v62 = vrot.slane %v1354_v30, 2 }
0x1c88   :  { %1379 = vrot.lane.b32.xlu0 %v1357_v62, %s1845_s18  ;;  %v1359_v63 = vadd.f32 %v1357_v62, %v2222_v55 }
0x1c8a   :  { %v1556_v56 = vmul.f32 -1.442695, %v1359_v63 }
0x1c8c   :  { %1670 = vpow2.f32 %v1556_v56 }
0x1c90   :  { %968 = vrot.lane.b32.xlu0 %v2168_v17, %s1846_s23 }
0x1c92   :  { %v1671_v32 = vpop.eup %1670 }
0x1c93   :  { %v1363_v0 = vadd.f32 1.0, %v1671_v32 }
0x1c95   :  { %1672 = vrcp.f32 %v1363_v0  ;;  %v1375_v35 = vand.u32 2147483648, %v1363_v0  ;;  %vm1369_vm15 = vweird.f32 %v1363_v0  ;;  %v1373_v38 = vand.u32 2147483647, %v1363_v0 }
0x1c97   :  { %v1376_v39 = vor.u32 1.1754944e-38, %v1375_v35  ;;  %vm1374_vm7 = vcmp.eq.f32.partialorder %v1373_v38, 8.507059e+37 }
0x1c98   :  { %1254 = vrot.lane.b32.xlu0 %v1252_v49, %s1846_s23  ;;  %v1408_v49 = vld [vmem:[#allocation9] sm:$0xff] }
0x1c9b   :  { %v1673_v18 = vpop.eup %1672 }
0x1c9c   :  { %v1365_v20 = vmul.f32 %v1673_v18, %v1363_v0  ;;  %vm1370_vm11 = vweird.f32 %v1673_v18 }
0x1c9d   :  { %vm1371_vm2 = vmor %vm1369_vm15, %vm1370_vm11 }
0x1c9e   :  { %v1366_v33 = vsub.f32 1.0, %v1365_v20 }
0x1ca0   :  { %v1367_v31 = vmul.f32 %v1673_v18, %v1366_v33 }
0x1ca2   :  { %v1368_v13 = vadd.f32 %v1673_v18, %v1367_v31 }
0x1ca4   :  { %v1372_v17 = vsel %vm1371_vm2, %v1673_v18, %v1368_v13 }
0x1ca5   :  { %v1377_v36 = vsel %vm1374_vm7, %v1376_v39, %v1372_v17 }
0x1ca6   :  { %v1397_v53 = vmul.f32 %v1395_v50, %v1377_v36 }
0x1cfa   :  { %v1380_v40 = vpop.permute.xlu0 %1379 }
0x1cfb   :  { %v1382_v41 = vmul.f32 %v1380_v40, %v1377_v36 }
0x1cfd   :  { %1384 = vrot.lane.b32.xlu1 %v1382_v41, %s1845_s18 }
0x1d02   :  { %v969_v42 = vpop.permute.xlu0 %968 }
0x1d03   :  { %971 = vst.msk [vmem:[#allocation2] sm:$0xc] %vm342_vm12, %v969_v42 }
0x1d05   :  { %1041 = vrot.lane.b32.xlu1 %v2187_v51, %s1846_s23  ;;  %v1411_v51 = vld [vmem:[#allocation9 + $0x18] sm:$0xff] }
0x1d06   :  { %1434 = vmatpush.msrb.mxu3 %v1411_v51 }
0x1d08   :  { %1435 = vmatpush.msrb.mxu3 %v1410_v3 }
0x1d0a   :  { %v1255_v43 = vpop.permute.xlu0 %1254  ;;  %1436 = vmatpush.msrb.mxu3 %v1409_v29 }
0x1d0b   :  { %1257 = vst.msk [vmem:[#allocation2 + $0x8] sm:$0xc] %vm342_vm12, %v1255_v43 }
0x1d0c   :  { %1437 = vmatpush.msrb.mxu3 %v1408_v49 }
0x1d0d   :  { %1327 = vrot.lane.b32.xlu1 %v1325_v25, %s1846_s23 }
0x1d6f   :  { %v1385_v44 = vpop.permute.xlu1 %1384 }
0x1d70   :  { %v1387_v37 = vadd.f32 %v1385_v44, %v2222_v55  ;;  %v1389_v55 = vsub.f32 1.0, %v1377_v36 }
0x1d72   :  { %1674 = vtanh.f32 %v1387_v37 }
0x1d77   :  { %v1042_v46 = vpop.permute.xlu1 %1041 }
0x1d78   :  { %v1675_v47 = vpop.eup %1674  ;;  %1044 = vst.msk [vmem:[#allocation2] sm:$0x30] %vm416_vm13, %v1042_v46 }
0x1d79   :  { %1391 = vrot.lane.b32.xlu2 %v1675_v47, %s1846_s23 }
0x1d7f   :  { %v1328_v48 = vpop.permute.xlu1 %1327 }
0x1d80   :  { %1330 = vst.msk [vmem:[#allocation2 + $0x8] sm:$0x30] %vm416_vm13, %v1328_v48 }
0x1d81   :  { %1114 = vrot.lane.b32.xlu2 %v2208_v45, %s1846_s23 }
0x1dd3   :  { %v1392_v52 = vpop.permute.xlu2 %1391 }
0x1dd4   :  { %v1394_v24 = vmul.f32 %v1392_v52, %v1389_v55 }
0x1dd6   :  { %v1398_v8 = vadd.f32 %v1397_v53, %v1394_v24 }
0x1dd8   :  { %1400 = vrot.lane.b32.xlu2 %v1398_v8, %s1846_s23 }
0x1ddb   :  { %v1115_v54 = vpop.permute.xlu2 %1114 }
0x1ddc   :  { %1117 = vst.msk [vmem:[#allocation2] sm:$0xc0] %vm490_vm14, %v1115_v54 }
0x1de3   :  { %v1406_v45 = vld [vmem:[#allocation2] sm:$0xff] }
0x1de4   :  { %1557 = vmatmul.msk.f32.vlgmr.msrb.gmra.mxu3 %vm163_vm0, %v1406_v45 }
0x1e32   :  { %v1401_v57 = vpop.permute.xlu2 %1400 }
0x1e33   :  { %1403 = vst.msk [vmem:[#allocation2 + $0x8] sm:$0xc0] %vm490_vm14, %v1401_v57 }
0x1e34   :  { %1405 = vst.msk [vmem:[#allocation12 - $0x4] sm:$0xc0] %vm490_vm14, %v1401_v57 }
0x1e35   :  { %1500 = dma.vmem_to_hbm [thread:$0]  %s1493_s27, 64, %s1495_s30, [#allocation13], %s1844_s15, %s1844_s15, %s1848_s11  }
0x1e3a   :  { %v1407_v58 = vld [vmem:[#allocation2 + $0x8] sm:$0xff] }
0x1e3b   :  { %1558 = vmatmul.msk.f32.gmra.mxu3 %vm163_vm0, %v1407_v58 }
0x1e67   :  { %v1439_v59 = vpop.f32.mrf.mxu3 }
0x1e68   :  { %v1440_v61 = vadd.f32 %v1579_v60, %v1439_v59 }
0x1e6a   :  { %v1445_v2 = vsel %vm123_vm1, %v1440_v61, -inf }
0x1ebe   :  { %v1442_v23 = vpop.f32.mrf.mxu3 }
0x1ebf   :  { %v1443_v1 = vadd.f32 %v1579_v60, %v1442_v23 }
0x1ec1   :  { %v1446_v4 = vsel %vm123_vm1, %v1443_v1, -inf }
0x1ec2   :  { %v1447_v5 = vmax.f32 %v1445_v2, %v1446_v4 }
0x1ec4   :  { %v1448_v6 = vsub.f32 %v1440_v61, %v1447_v5  ;;  %v1449_v7 = vsub.f32 %v1443_v1, %v1447_v5 }
0x1ec6   :  { %v1450_v34 = vmul.f32 1.442695, %v1448_v6  ;;  %v1452_v9 = vmul.f32 1.442695, %v1449_v7 }
0x1ec8   :  { %1676 = vpow2.f32 %v1450_v34 }
0x1ec9   :  { %1678 = vpow2.f32 %v1452_v9 }
0x1ece   :  { %v1677_v11 = vpop.eup %1676 }
0x1ecf   :  { %v1679_v12 = vpop.eup %1678  ;;  %v1454_v14 = vsel %vm123_vm1, %v1677_v11, 0.0 }
0x1ed0   :  { %v1455_v15 = vsel %vm123_vm1, %v1679_v12, 0.0 }
0x1ed1   :  { %v1456_v16 = vadd.f32 %v1455_v15, %v1454_v14 }
0x1ed3   :  { %1680 = vrcp.f32 %v1456_v16  ;;  %v1468_v22 = vand.u32 2147483648, %v1456_v16  ;;  %v1466_v26 = vand.u32 2147483647, %v1456_v16  ;;  %vm1462_vm12 = vweird.f32 %v1456_v16 }
0x1ed5   :  { %v1469_v28 = vor.u32 1.1754944e-38, %v1468_v22  ;;  %vm1467_vm14 = vcmp.eq.f32.partialorder %v1466_v26, 8.507059e+37 }
0x1ed9   :  { %v1681_v19 = vpop.eup %1680 }
0x1eda   :  { %v1458_v21 = vmul.f32 %v1681_v19, %v1456_v16  ;;  %vm1463_vm0 = vweird.f32 %v1681_v19 }
0x1edb   :  { %vm1464_vm13 = vmor %vm1462_vm12, %vm1463_vm0 }
0x1edc   :  { %v1459_v10 = vsub.f32 1.0, %v1458_v21 }
0x1ede   :  { %v1460_v25 = vmul.f32 %v1681_v19, %v1459_v10 }
0x1ee0   :  { %v1461_v27 = vadd.f32 %v1681_v19, %v1460_v25 }
0x1ee2   :  { %v1465_v30 = vsel %vm1464_vm13, %v1681_v19, %v1461_v27 }
0x1ee3   :  { %v1470_v62 = vsel %vm1467_vm14, %v1469_v28, %v1465_v30 }
0x1ee4   :  { %v1471_v63 = vmul.f32 %v1677_v11, %v1470_v62  ;;  %v1472_v56 = vmul.f32 %v1679_v12, %v1470_v62 }
0x1ee6   :  { %1473 = vst.msk [vmem:[#allocation11] sm:$0xff] %vm123_vm1, %v1471_v63 }
0x1ee7   :  { %1474 = vst.msk [vmem:[#allocation11 + $0x8] sm:$0xff] %vm123_vm1, %v1472_v56 }
0x1ee8   :  { %1487 = dma.vmem_to_hbm [thread:$0]  %s1480_s10, 256, %s1482_s14, [#allocation5], %s1837_s21, %s1837_s21, %s1838_s22  }
0x1ee9   :  { %1832 = dma.done.wait [#allocation5], 256  }
0x1eea   :  { %1833 = vsyncadd [#allocation5], 4294967040 }
0x1eeb   :  { %1834 = dma.done.wait [#allocation13], 64  }
0x1eec   :  { %1835 = vsyncadd [#allocation13], 4294967232 }
0x1eed   :  { %1509 = vsyncpa [#allocation4], 1 }
0x1eee   :  { %1510 = vsyncpa [#allocation7], 1 }
0x1eef   :  { %1511 = vsyncpa [#allocation10], 1 }
0x1ef0   :  { %1512 = vsyncpa [#allocation5], 1 }
0x1ef1   :  { %1513 = vsyncpa [#allocation13], 1 }

</bundles_post_ra>
